<compile_context>
chip_gen: v6e
topology: v6e:2x2x1
jax: 0.10.0
libtpu: 0.0.40
codegen_flags: <defaults>
</compile_context>

<pallas_src>
import functools
import math

import jax
import jax.numpy as jnp
from jax.experimental import pallas as pl
from jax.experimental.pallas import tpu as pltpu


# Raised scoped-VMEM limit: above the 16/32 MiB defaults, below v7x's 64 MiB
# physical VMEM so there is headroom on every chip generation.
_VMEM_LIMIT_BYTES = 48 * 1024 * 1024


# ----------------------------- in-kernel math ------------------------------

def _erf(x):
    # Abramowitz & Stegun 7.1.26 (|abs err| < 1.5e-7).  Uses only
    # exp / mul / add / where, which all have Mosaic lowerings.
    ax = jnp.abs(x)
    t = 1.0 / (1.0 + 0.3275911 * ax)
    poly = t * (0.254829592 + t * (-0.284496736 + t * (1.421413741
             + t * (-1.453152027 + t * 1.061405429))))
    y = 1.0 - poly * jnp.exp(-(ax * ax))
    return jnp.where(x >= 0.0, y, -y)


def _gelu(x):
    # exact (erf-based) gelu, matching torch.nn.functional.gelu default
    return 0.5 * x * (1.0 + _erf(x * 0.7071067811865476))


def _layer_norm(x, gamma, beta, eps):
    mean = jnp.mean(x, axis=-1, keepdims=True)
    xc = x - mean
    var = jnp.mean(xc * xc, axis=-1, keepdims=True)
    inv = jax.lax.rsqrt(var + eps)
    return xc * inv * gamma + beta


# --------------------------- layernorm kernel -------------------------------

def _layernorm_kernel(x_ref, g_ref, b_ref, o_ref, *, eps):
    o_ref[...] = _layer_norm(x_ref[...], g_ref[...], b_ref[...], eps)


def layernorm(x, gamma, beta, eps, block_rows=512):
    # x: (R, D); gamma/beta: (1, D).  Tiled over rows so DMA overlaps compute
    # and VMEM stays bounded at realistic N*S.
    R, D = x.shape
    tr = block_rows if (R % block_rows == 0) else R
    return pl.pallas_call(
        functools.partial(_layernorm_kernel, eps=eps),
        out_shape=jax.ShapeDtypeStruct((R, D), x.dtype),
        grid=(R // tr,),
        in_specs=[
            pl.BlockSpec((tr, D), lambda i: (i, 0)),
            pl.BlockSpec((1, D), lambda i: (0, 0)),
            pl.BlockSpec((1, D), lambda i: (0, 0)),
        ],
        out_specs=pl.BlockSpec((tr, D), lambda i: (i, 0)),
        compiler_params=pltpu.CompilerParams(
            dimension_semantics=("parallel",),
            vmem_limit_bytes=_VMEM_LIMIT_BYTES,
        ),
    )(x, gamma, beta)


# ---------------------- fused transformer encoder layer ---------------------

def _encoder_layer_kernel(x_ref, wqkv_ref, bqkv_ref, wo_ref, bo_ref,
                          g1_ref, bn1_ref, w1_ref, b1_ref, w2_ref, b2_ref,
                          g2_ref, bn2_ref, o_ref, ctx_ref, *, nhead, d_model):
    x = x_ref[0]                                   # (S, D) float32
    dh = d_model // nhead
    scale = 1.0 / math.sqrt(dh)
    cdt = wqkv_ref.dtype                           # MXU operand dtype

    # Fused QKV projection: one (S,D)x(D,3D) MXU matmul, f32 accumulation.
    qkv = (jnp.dot(x.astype(cdt), wqkv_ref[...],
                   preferred_element_type=jnp.float32) + bqkv_ref[...])

    # Per-head attention; each head's context is written into a VMEM scratch
    # at a static lane offset (no lane-axis concatenate), then a single
    # (S,D)x(D,D) out-projection keeps the MXU contraction wide.
    # TODO(synk): at real sizes (nhead=12, dh=64) batch heads in a single
    # 3-D dot_general / pack 2 heads per 128-lane tile to fill the MXU.
    for h in range(nhead):
        qh = qkv[:, h * dh:(h + 1) * dh] * scale
        kh = qkv[:, d_model + h * dh: d_model + (h + 1) * dh]
        vh = qkv[:, 2 * d_model + h * dh: 2 * d_model + (h + 1) * dh]
        s = jax.lax.dot_general(qh, kh, (((1,), (1,)), ((), ())),
                                preferred_element_type=jnp.float32)   # (S, S)
        s = s - jnp.max(s, axis=-1, keepdims=True)
        p = jnp.exp(s)
        # divide -> EUP reciprocal (frees VALU slots on the attention path)
        p = p * pl.reciprocal(jnp.sum(p, axis=-1, keepdims=True), approx=True)
        ctx_ref[:, h * dh:(h + 1) * dh] = jnp.dot(
            p.astype(cdt), vh.astype(cdt), preferred_element_type=jnp.float32)

    attn = (jnp.dot(ctx_ref[...].astype(cdt), wo_ref[...],
                    preferred_element_type=jnp.float32) + bo_ref[...])

    # residual + post-norm (nn.LayerNorm default eps=1e-5); LN stays f32
    x = _layer_norm(x + attn, g1_ref[...], bn1_ref[...], 1e-5)

    ff = (jnp.dot(x.astype(cdt), w1_ref[...],
                  preferred_element_type=jnp.float32) + b1_ref[...])
    ff = _gelu(ff)
    ff = (jnp.dot(ff.astype(cdt), w2_ref[...],
                  preferred_element_type=jnp.float32) + b2_ref[...])

    x = _layer_norm(x + ff, g2_ref[...], bn2_ref[...], 1e-5)
    o_ref[0] = x.astype(o_ref.dtype)


def encoder_layer(x, lp, nhead, matmul_dtype=jnp.float32):
    # x: (N, S, D).  Weights cast to matmul_dtype (bf16 on v6e/v7x halves
    # weight VMEM/HBM traffic); biases / LN params stay f32.
    N, S, D = x.shape
    nhid = lp["w1"].shape[-1]

    wqkv = jnp.concatenate([lp["wq"], lp["wk"], lp["wv"]], axis=1)
    bqkv = jnp.concatenate([lp["bq"], lp["bk"], lp["bv"]], axis=1)
    args = [
        wqkv.astype(matmul_dtype), bqkv,
        lp["wo"].astype(matmul_dtype), lp["bo"],
        lp["ln1_g"], lp["ln1_b"],
        lp["w1"].astype(matmul_dtype), lp["b1"],
        lp["w2"].astype(matmul_dtype), lp["b2"],
        lp["ln2_g"], lp["ln2_b"],
    ]

    def full_spec(arr):
        # TODO(synk): pipeline_mode=pl.Buffered(1) would avoid double-buffering
        # these constant-index weights (halves weight VMEM at real sizes).
        return pl.BlockSpec(arr.shape, lambda n: tuple(0 for _ in arr.shape))

    in_specs = [pl.BlockSpec((1, S, D), lambda n: (n, 0, 0))]
    in_specs += [full_spec(a) for a in args]

    cost = pl.CostEstimate(
        flops=int(N * (8 * S * D * D + 4 * S * S * D + 4 * S * D * nhid)),
        transcendentals=int(N * (nhead * S * S + S * nhid)),
        bytes_accessed=int(2 * N * S * D * 4
                           + sum(a.size * a.dtype.itemsize for a in args)),
    )

    return pl.pallas_call(
        functools.partial(_encoder_layer_kernel, nhead=nhead, d_model=D),
        out_shape=jax.ShapeDtypeStruct((N, S, D), x.dtype),
        grid=(N,),
        in_specs=in_specs,
        out_specs=pl.BlockSpec((1, S, D), lambda n: (n, 0, 0)),
        scratch_shapes=[pltpu.VMEM((S, D), jnp.float32)],   # per-head context
        compiler_params=pltpu.CompilerParams(
            dimension_semantics=("parallel",),
            vmem_limit_bytes=_VMEM_LIMIT_BYTES,
        ),
        cost_estimate=cost,
    )(x, *args)


# ------------------------------- MLM head -----------------------------------

def _mlm_head_kernel(x_ref, ws_ref, bs_ref, g_ref, b_ref, wh_ref, bh_ref,
                     o_ref, h_ref):
    # Grid = (row_tiles, vocab_tiles).  The gelu+LN hidden is computed once
    # per row tile (vocab tile 0) into a VMEM scratch and reused for every
    # vocab tile of that row tile.
    @pl.when(pl.program_id(1) == 0)
    def _():
        cdt = ws_ref.dtype
        h = _gelu(jnp.dot(x_ref[...].astype(cdt), ws_ref[...],
                          preferred_element_type=jnp.float32) + bs_ref[...])
        h_ref[...] = _layer_norm(h, g_ref[...], b_ref[...], 1e-12)

    logits = (jnp.dot(h_ref[...].astype(wh_ref.dtype), wh_ref[...],
                      preferred_element_type=jnp.float32) + bh_ref[...])
    o_ref[...] = logits.astype(o_ref.dtype)


def mlm_head(x_rows, params, matmul_dtype=jnp.float32,
             tile_rows=512, tile_v=2048):
    # x_rows: (R, D) with rows already in (seq, batch)-major order, so the
    # (R, V) output reshapes for free to (S, N, V) — no logits transpose.
    R, D = x_rows.shape
    V = params["head_w"].shape[-1]

    tr = tile_rows if (R % tile_rows == 0) else R
    tv = min(tile_v, V)
    if (V % tv != 0) or (tv % 128 != 0):
        tv = V                        # fall back to a single full-vocab tile
    n_rt, n_vt = R // tr, V // tv

    args = [params["span_w"].astype(matmul_dtype), params["span_b"],
            params["head_ln_g"], params["head_ln_b"],
            params["head_w"].astype(matmul_dtype), params["head_b"]]

    in_specs = [
        pl.BlockSpec((tr, D), lambda r, v: (r, 0)),          # x row tile
        pl.BlockSpec(args[0].shape, lambda r, v: (0, 0)),    # span_w
        pl.BlockSpec(args[1].shape, lambda r, v: (0, 0)),    # span_b
        pl.BlockSpec(args[2].shape, lambda r, v: (0, 0)),    # head_ln_g
        pl.BlockSpec(args[3].shape, lambda r, v: (0, 0)),    # head_ln_b
        pl.BlockSpec((D, tv), lambda r, v: (0, v)),          # head_w vocab tile
        pl.BlockSpec((1, tv), lambda r, v: (0, v)),          # head_b vocab tile
    ]

    cost = pl.CostEstimate(
        flops=int(2 * R * D * D + 2 * R * D * V),
        transcendentals=int(R * D),
        bytes_accessed=int(R * D * 4 + R * V * 4
                           + sum(a.size * a.dtype.itemsize for a in args)),
    )

    return pl.pallas_call(
        _mlm_head_kernel,
        out_shape=jax.ShapeDtypeStruct((R, V), jnp.float32),
        grid=(n_rt, n_vt),
        in_specs=in_specs,
        out_specs=pl.BlockSpec((tr, tv), lambda r, v: (r, v)),
        scratch_shapes=[pltpu.VMEM((tr, D), jnp.float32)],   # gelu+LN hidden
        compiler_params=pltpu.CompilerParams(
            dimension_semantics=("parallel", "arbitrary"),  # scratch per row tile
            vmem_limit_bytes=_VMEM_LIMIT_BYTES,
        ),
        cost_estimate=cost,
    )(x_rows, *args)


# ------------------------------ glue / model --------------------------------

def bert_embedding(src_ids, params):
    # src_ids: (N, S) int32
    # token + positional + token-type(=0) embeddings, then LayerNorm (Pallas).
    # TODO(synk): embedding-table gather stays in plain JAX (no clean Pallas gather).
    N, S = src_ids.shape
    tok = params["tok_emb"][src_ids]                      # (N, S, D)
    pos = params["pos_emb"][:S][None, :, :]               # (1, S, D)
    typ = params["type_emb"][0][None, None, :]            # (1, 1, D)
    e = tok + pos + typ
    D = e.shape[-1]
    out = layernorm(e.reshape(N * S, D), params["emb_ln_g"],
                    params["emb_ln_b"], 1e-5)
    # dropout(p=0.5) -> identity (inference)
    return out.reshape(N, S, D)


def mlm_task_forward(src_ids, params, nhead, matmul_dtype=jnp.float32):
    x = bert_embedding(src_ids, params)                   # (N, S, D)
    for layer_params in params["layers"]:
        x = encoder_layer(x, layer_params, nhead, matmul_dtype)

    N, S, D = x.shape
    V = params["head_w"].shape[-1]
    # Cheap (S*N*D) transpose of the activation so the head kernel can emit
    # logits lane-dense and already in (seq, batch) row order — avoids an
    # expensive post-hoc transpose of the (S, N, V) logits.
    x_rows = jnp.transpose(x, (1, 0, 2)).reshape(S * N, D)
    logits = mlm_head(x_rows, params, matmul_dtype)       # (S*N, V)
    return logits.reshape(S, N, V)                        # free metadata reshape


# ------------------------------ param init ----------------------------------

def init_params(key, ntoken, ninp, nhead, nhid, nlayers, max_len=64):
    keys = iter(jax.random.split(key, 64))

    def normal(shape, std=0.02):
        return (std * jax.random.normal(next(keys), shape)).astype(jnp.float32)

    def zeros(shape):
        return jnp.zeros(shape, jnp.float32)

    def ones(shape):
        return jnp.ones(shape, jnp.float32)

    params = {
        "tok_emb": normal((ntoken, ninp)),
        "pos_emb": normal((max_len, ninp)),
        "type_emb": normal((2, ninp)),
        "emb_ln_g": ones((1, ninp)),
        "emb_ln_b": zeros((1, ninp)),
        "layers": [],
        "span_w": normal((ninp, ninp)),
        "span_b": zeros((1, ninp)),
        "head_ln_g": ones((1, ninp)),
        "head_ln_b": zeros((1, ninp)),
        "head_w": normal((ninp, ntoken)),
        "head_b": zeros((1, ntoken)),
    }
    for _ in range(nlayers):
        params["layers"].append({
            "wq": normal((ninp, ninp)), "bq": zeros((1, ninp)),
            "wk": normal((ninp, ninp)), "bk": zeros((1, ninp)),
            "wv": normal((ninp, ninp)), "bv": zeros((1, ninp)),
            "wo": normal((ninp, ninp)), "bo": zeros((1, ninp)),
            "ln1_g": ones((1, ninp)), "ln1_b": zeros((1, ninp)),
            "w1": normal((ninp, nhid)), "b1": zeros((1, nhid)),
            "w2": normal((nhid, ninp)), "b2": zeros((1, ninp)),
            "ln2_g": ones((1, ninp)), "ln2_b": zeros((1, ninp)),
        })
    return params


# --------------------------------- main --------------------------------------

if __name__ == "__main__":
    ntoken, ninp, nhead, nhid, nlayers = 128, 32, 2, 64, 2
    N, S = 2, 8

    key = jax.random.PRNGKey(0)
    k_params, k_data = jax.random.split(key)
    params = init_params(k_params, ntoken, ninp, nhead, nhid, nlayers)
    src = jax.random.randint(k_data, (N, S), 0, ntoken, dtype=jnp.int32)

    # matmul_dtype=jnp.bfloat16 is recommended on v6e/v7x (MXU operands only;
    # LN/gelu/softmax and accumulation stay f32).  Default f32 keeps exact
    # reference semantics for this toy run.
    fwd = jax.jit(mlm_task_forward, static_argnames=("nhead", "matmul_dtype"))
    out = fwd(src, params, nhead=nhead, matmul_dtype=jnp.float32)
    out = jax.block_until_ready(out)
    assert out.shape == (S, N, ntoken), out.shape
    assert out.dtype == jnp.float32
    print("KERNEL_OK")
</pallas_src>

<mosaic_0001>
module attributes {stable_mosaic.version = 11 : i64} {
  func.func @_layernorm_kernel(%arg0: i32, %arg1: memref<16x32xf32, #tpu.memory_space<vmem>>, %arg2: memref<1x32xf32, #tpu.memory_space<vmem>>, %arg3: memref<1x32xf32, #tpu.memory_space<vmem>>, %arg4: memref<16x32xf32, #tpu.memory_space<vmem>>) attributes {dimension_semantics = [#tpu.dimension_semantics<parallel>], iteration_bounds = array<i64: 1>, scalar_prefetch = 0 : i64, scratch_operands = 0 : i64, tpu.core_type = #tpu.core_type<tc>, window_params = [{transform_indices = @transform_0, window_bounds = array<i64: 16, 32>}, {pipeline_mode = #tpu.pipeline_mode<synchronous>, transform_indices = @transform_1, window_bounds = array<i64: 1, 32>}, {pipeline_mode = #tpu.pipeline_mode<synchronous>, transform_indices = @transform_2, window_bounds = array<i64: 1, 32>}, {transform_indices = @transform_3, window_bounds = array<i64: 16, 32>}]} {
    %c0 = arith.constant 0 : index
    %c0_0 = arith.constant 0 : index
    %0 = vector.load %arg1[%c0, %c0_0] : memref<16x32xf32, #tpu.memory_space<vmem>>, vector<16x32xf32>
    %c0_1 = arith.constant 0 : index
    %c0_2 = arith.constant 0 : index
    %1 = vector.load %arg2[%c0_1, %c0_2] : memref<1x32xf32, #tpu.memory_space<vmem>>, vector<1x32xf32>
    %c0_3 = arith.constant 0 : index
    %c0_4 = arith.constant 0 : index
    %2 = vector.load %arg3[%c0_3, %c0_4] : memref<1x32xf32, #tpu.memory_space<vmem>>, vector<1x32xf32>
    %cst = arith.constant dense<0.000000e+00> : vector<16xf32>
    %3 = vector.multi_reduction <add>, %0, %cst [1] : vector<16x32xf32> to vector<16xf32>
    %4 = vector.shape_cast %3 : vector<16xf32> to vector<16x1xf32>
    %cst_5 = arith.constant 3.200000e+01 : f32
    %5 = vector.broadcast %cst_5 : f32 to vector<16x1xf32>
    %6 = arith.divf %4, %5 : vector<16x1xf32>
    %7 = vector.broadcast %6 : vector<16x1xf32> to vector<16x32xf32>
    %8 = arith.subf %0, %7 : vector<16x32xf32>
    %9 = arith.mulf %8, %8 : vector<16x32xf32>
    %cst_6 = arith.constant dense<0.000000e+00> : vector<16xf32>
    %10 = vector.multi_reduction <add>, %9, %cst_6 [1] : vector<16x32xf32> to vector<16xf32>
    %11 = vector.shape_cast %10 : vector<16xf32> to vector<16x1xf32>
    %cst_7 = arith.constant 3.200000e+01 : f32
    %12 = vector.broadcast %cst_7 : f32 to vector<16x1xf32>
    %13 = arith.divf %11, %12 : vector<16x1xf32>
    %cst_8 = arith.constant 9.99999974E-6 : f32
    %14 = vector.broadcast %cst_8 : f32 to vector<16x1xf32>
    %15 = arith.addf %13, %14 : vector<16x1xf32>
    %16 = math.rsqrt %15 : vector<16x1xf32>
    %17 = vector.broadcast %16 : vector<16x1xf32> to vector<16x32xf32>
    %18 = arith.mulf %8, %17 : vector<16x32xf32>
    %19 = vector.broadcast %1 : vector<1x32xf32> to vector<16x32xf32>
    %20 = arith.mulf %18, %19 : vector<16x32xf32>
    %21 = vector.broadcast %2 : vector<1x32xf32> to vector<16x32xf32>
    %22 = arith.addf %20, %21 : vector<16x32xf32>
    %c0_9 = arith.constant 0 : index
    %c0_10 = arith.constant 0 : index
    %23 = vector.load %arg4[%c0_9, %c0_10] : memref<16x32xf32, #tpu.memory_space<vmem>>, vector<16x32xf32>
    tpu.vector_store %arg4[%c0_9, %c0_10], %22 {strides = array<i32>} : memref<16x32xf32, #tpu.memory_space<vmem>>, vector<16x32xf32>,
    return
  }
  func.func @transform_0(%arg0: i32) -> (i32, i32) {
    %c0_i32 = arith.constant 0 : i32
    %c0_i32_0 = arith.constant 0 : i32
    return %arg0, %c0_i32 : i32, i32
  }
  func.func @transform_1(%arg0: i32) -> (i32, i32) {
    %c0_i32 = arith.constant 0 : i32
    %c0_i32_0 = arith.constant 0 : i32
    %c0_i32_1 = arith.constant 0 : i32
    return %c0_i32, %c0_i32_0 : i32, i32
  }
  func.func @transform_2(%arg0: i32) -> (i32, i32) {
    %c0_i32 = arith.constant 0 : i32
    %c0_i32_0 = arith.constant 0 : i32
    %c0_i32_1 = arith.constant 0 : i32
    return %c0_i32, %c0_i32_0 : i32, i32
  }
  func.func @transform_3(%arg0: i32) -> (i32, i32) {
    %c0_i32 = arith.constant 0 : i32
    %c0_i32_0 = arith.constant 0 : i32
    return %arg0, %c0_i32 : i32, i32
  }
}

module attributes {stable_mosaic.version = 11 : i64} {
  func.func @_mlm_head_kernel(%arg0: i32, %arg1: i32, %arg2: memref<16x32xf32, #tpu.memory_space<vmem>>, %arg3: memref<32x32xf32, #tpu.memory_space<vmem>>, %arg4: memref<1x32xf32, #tpu.memory_space<vmem>>, %arg5: memref<1x32xf32, #tpu.memory_space<vmem>>, %arg6: memref<1x32xf32, #tpu.memory_space<vmem>>, %arg7: memref<32x128xf32, #tpu.memory_space<vmem>>, %arg8: memref<1x128xf32, #tpu.memory_space<vmem>>, %arg9: memref<16x128xf32, #tpu.memory_space<vmem>>, %arg10: memref<16x32xf32, #tpu.memory_space<vmem>>) attributes {dimension_semantics = [#tpu.dimension_semantics<parallel>, #tpu.dimension_semantics<arbitrary>], iteration_bounds = array<i64: 1, 1>, scalar_prefetch = 0 : i64, scratch_operands = 1 : i64, tpu.core_type = #tpu.core_type<tc>, window_params = [{transform_indices = @transform_0, window_bounds = array<i64: 16, 32>}, {pipeline_mode = #tpu.pipeline_mode<synchronous>, transform_indices = @transform_1, window_bounds = array<i64: 32, 32>}, {pipeline_mode = #tpu.pipeline_mode<synchronous>, transform_indices = @transform_2, window_bounds = array<i64: 1, 32>}, {pipeline_mode = #tpu.pipeline_mode<synchronous>, transform_indices = @transform_3, window_bounds = array<i64: 1, 32>}, {pipeline_mode = #tpu.pipeline_mode<synchronous>, transform_indices = @transform_4, window_bounds = array<i64: 1, 32>}, {transform_indices = @transform_5, window_bounds = array<i64: 32, 128>}, {transform_indices = @transform_6, window_bounds = array<i64: 1, 128>}, {transform_indices = @transform_7, window_bounds = array<i64: 16, 128>}]} {
    %c0_i32 = arith.constant 0 : i32
    %0 = arith.cmpi eq, %arg1, %c0_i32 : i32
    %1 = arith.extui %0 : i1 to i32
    %c0_i32_0 = arith.constant 0 : i32
    %2 = arith.cmpi ne, %1, %c0_i32_0 : i32
    scf.if %2 {
      %c0_8 = arith.constant 0 : index
      %c0_9 = arith.constant 0 : index
      %10 = vector.load %arg2[%c0_8, %c0_9] : memref<16x32xf32, #tpu.memory_space<vmem>>, vector<16x32xf32>
      %c0_10 = arith.constant 0 : index
      %c0_11 = arith.constant 0 : index
      %11 = vector.load %arg3[%c0_10, %c0_11] : memref<32x32xf32, #tpu.memory_space<vmem>>, vector<32x32xf32>
      %cst_12 = arith.constant dense<0.000000e+00> : vector<16x32xf32>
      %12 = tpu.matmul %10, %11, %cst_12 {dimension_numbers = #tpu.dot_dimension_numbers<[1], [0], [0], [1], [0, 0, 1, 1], [], []>} : vector<16x32xf32>, vector<32x32xf32>, vector<16x32xf32> -> vector<16x32xf32>
      %c0_13 = arith.constant 0 : index
      %c0_14 = arith.constant 0 : index
      %13 = vector.load %arg4[%c0_13, %c0_14] : memref<1x32xf32, #tpu.memory_space<vmem>>, vector<1x32xf32>
      %14 = vector.broadcast %13 : vector<1x32xf32> to vector<16x32xf32>
      %15 = arith.addf %12, %14 : vector<16x32xf32>
      %cst_15 = arith.constant 5.000000e-01 : f32
      %16 = vector.broadcast %cst_15 : f32 to vector<16x32xf32>
      %17 = arith.mulf %16, %15 : vector<16x32xf32>
      %cst_16 = arith.constant 0.707106769 : f32
      %18 = vector.broadcast %cst_16 : f32 to vector<16x32xf32>
      %19 = arith.mulf %15, %18 : vector<16x32xf32>
      %20 = math.absf %19 : vector<16x32xf32>
      %cst_17 = arith.constant 0.327591091 : f32
      %21 = vector.broadcast %cst_17 : f32 to vector<16x32xf32>
      %22 = arith.mulf %21, %20 : vector<16x32xf32>
      %cst_18 = arith.constant 1.000000e+00 : f32
      %23 = vector.broadcast %cst_18 : f32 to vector<16x32xf32>
      %24 = arith.addf %23, %22 : vector<16x32xf32>
      %cst_19 = arith.constant 1.000000e+00 : f32
      %25 = vector.broadcast %cst_19 : f32 to vector<16x32xf32>
      %26 = arith.divf %25, %24 : vector<16x32xf32>
      %cst_20 = arith.constant 1.06140542 : f32
      %27 = vector.broadcast %cst_20 : f32 to vector<16x32xf32>
      %28 = arith.mulf %26, %27 : vector<16x32xf32>
      %cst_21 = arith.constant -1.45315206 : f32
      %29 = vector.broadcast %cst_21 : f32 to vector<16x32xf32>
      %30 = arith.addf %29, %28 : vector<16x32xf32>
      %31 = arith.mulf %26, %30 : vector<16x32xf32>
      %cst_22 = arith.constant 1.42141378 : f32
      %32 = vector.broadcast %cst_22 : f32 to vector<16x32xf32>
      %33 = arith.addf %32, %31 : vector<16x32xf32>
      %34 = arith.mulf %26, %33 : vector<16x32xf32>
      %cst_23 = arith.constant -0.284496725 : f32
      %35 = vector.broadcast %cst_23 : f32 to vector<16x32xf32>
      %36 = arith.addf %35, %34 : vector<16x32xf32>
      %37 = arith.mulf %26, %36 : vector<16x32xf32>
      %cst_24 = arith.constant 0.254829586 : f32
      %38 = vector.broadcast %cst_24 : f32 to vector<16x32xf32>
      %39 = arith.addf %38, %37 : vector<16x32xf32>
      %40 = arith.mulf %26, %39 : vector<16x32xf32>
      %41 = arith.mulf %20, %20 : vector<16x32xf32>
      %cst_25 = arith.constant 0.000000e+00 : f32
      %42 = vector.broadcast %cst_25 : f32 to vector<16x32xf32>
      %43 = arith.subf %42, %41 : vector<16x32xf32>
      %44 = math.exp %43 : vector<16x32xf32>
      %45 = arith.mulf %40, %44 : vector<16x32xf32>
      %cst_26 = arith.constant 1.000000e+00 : f32
      %46 = vector.broadcast %cst_26 : f32 to vector<16x32xf32>
      %47 = arith.subf %46, %45 : vector<16x32xf32>
      %cst_27 = arith.constant 0.000000e+00 : f32
      %48 = vector.broadcast %cst_27 : f32 to vector<16x32xf32>
      %49 = arith.cmpf oge, %19, %48 : vector<16x32xf32>
      %cst_28 = arith.constant 0.000000e+00 : f32
      %50 = vector.broadcast %cst_28 : f32 to vector<16x32xf32>
      %51 = arith.subf %50, %47 : vector<16x32xf32>
      %52 = arith.select %49, %47, %51 : vector<16x32xi1>, vector<16x32xf32>
      %cst_29 = arith.constant 1.000000e+00 : f32
      %53 = vector.broadcast %cst_29 : f32 to vector<16x32xf32>
      %54 = arith.addf %53, %52 : vector<16x32xf32>
      %55 = arith.mulf %17, %54 : vector<16x32xf32>
      %c0_30 = arith.constant 0 : index
      %c0_31 = arith.constant 0 : index
      %56 = vector.load %arg5[%c0_30, %c0_31] : memref<1x32xf32, #tpu.memory_space<vmem>>, vector<1x32xf32>
      %c0_32 = arith.constant 0 : index
      %c0_33 = arith.constant 0 : index
      %57 = vector.load %arg6[%c0_32, %c0_33] : memref<1x32xf32, #tpu.memory_space<vmem>>, vector<1x32xf32>
      %cst_34 = arith.constant dense<0.000000e+00> : vector<16xf32>
      %58 = vector.multi_reduction <add>, %55, %cst_34 [1] : vector<16x32xf32> to vector<16xf32>
      %59 = vector.shape_cast %58 : vector<16xf32> to vector<16x1xf32>
      %cst_35 = arith.constant 3.200000e+01 : f32
      %60 = vector.broadcast %cst_35 : f32 to vector<16x1xf32>
      %61 = arith.divf %59, %60 : vector<16x1xf32>
      %62 = vector.broadcast %61 : vector<16x1xf32> to vector<16x32xf32>
      %63 = arith.subf %55, %62 : vector<16x32xf32>
      %64 = arith.mulf %63, %63 : vector<16x32xf32>
      %cst_36 = arith.constant dense<0.000000e+00> : vector<16xf32>
      %65 = vector.multi_reduction <add>, %64, %cst_36 [1] : vector<16x32xf32> to vector<16xf32>
      %66 = vector.shape_cast %65 : vector<16xf32> to vector<16x1xf32>
      %cst_37 = arith.constant 3.200000e+01 : f32
      %67 = vector.broadcast %cst_37 : f32 to vector<16x1xf32>
      %68 = arith.divf %66, %67 : vector<16x1xf32>
      %cst_38 = arith.constant 9.99999996E-13 : f32
      %69 = vector.broadcast %cst_38 : f32 to vector<16x1xf32>
      %70 = arith.addf %68, %69 : vector<16x1xf32>
      %71 = math.rsqrt %70 : vector<16x1xf32>
      %72 = vector.broadcast %71 : vector<16x1xf32> to vector<16x32xf32>
      %73 = arith.mulf %63, %72 : vector<16x32xf32>
      %74 = vector.broadcast %56 : vector<1x32xf32> to vector<16x32xf32>
      %75 = arith.mulf %73, %74 : vector<16x32xf32>
      %76 = vector.broadcast %57 : vector<1x32xf32> to vector<16x32xf32>
      %77 = arith.addf %75, %76 : vector<16x32xf32>
      %c0_39 = arith.constant 0 : index
      %c0_40 = arith.constant 0 : index
      %78 = vector.load %arg10[%c0_39, %c0_40] : memref<16x32xf32, #tpu.memory_space<vmem>>, vector<16x32xf32>
      tpu.vector_store %arg10[%c0_39, %c0_40], %77 {strides = array<i32>} : memref<16x32xf32, #tpu.memory_space<vmem>>, vector<16x32xf32>,
    } else {
    }
    %c0 = arith.constant 0 : index
    %c0_1 = arith.constant 0 : index
    %3 = vector.load %arg10[%c0, %c0_1] : memref<16x32xf32, #tpu.memory_space<vmem>>, vector<16x32xf32>
    %c0_2 = arith.constant 0 : index
    %c0_3 = arith.constant 0 : index
    %4 = vector.load %arg7[%c0_2, %c0_3] : memref<32x128xf32, #tpu.memory_space<vmem>>, vector<32x128xf32>
    %cst = arith.constant dense<0.000000e+00> : vector<16x128xf32>
    %5 = tpu.matmul %3, %4, %cst {dimension_numbers = #tpu.dot_dimension_numbers<[1], [0], [0], [1], [0, 0, 1, 1], [], []>} : vector<16x32xf32>, vector<32x128xf32>, vector<16x128xf32> -> vector<16x128xf32>
    %c0_4 = arith.constant 0 : index
    %c0_5 = arith.constant 0 : index
    %6 = vector.load %arg8[%c0_4, %c0_5] : memref<1x128xf32, #tpu.memory_space<vmem>>, vector<1x128xf32>
    %7 = vector.broadcast %6 : vector<1x128xf32> to vector<16x128xf32>
    %8 = arith.addf %5, %7 : vector<16x128xf32>
    %c0_6 = arith.constant 0 : index
    %c0_7 = arith.constant 0 : index
    %9 = vector.load %arg9[%c0_6, %c0_7] : memref<16x128xf32, #tpu.memory_space<vmem>>, vector<16x128xf32>
    tpu.vector_store %arg9[%c0_6, %c0_7], %8 {strides = array<i32>} : memref<16x128xf32, #tpu.memory_space<vmem>>, vector<16x128xf32>,
    return
  }
  func.func @transform_0(%arg0: i32, %arg1: i32) -> (i32, i32) {
    %c0_i32 = arith.constant 0 : i32
    %c0_i32_0 = arith.constant 0 : i32
    return %arg0, %c0_i32 : i32, i32
  }
  func.func @transform_1(%arg0: i32, %arg1: i32) -> (i32, i32) {
    %c0_i32 = arith.constant 0 : i32
    %c0_i32_0 = arith.constant 0 : i32
    %c0_i32_1 = arith.constant 0 : i32
    return %c0_i32, %c0_i32_0 : i32, i32
  }
  func.func @transform_2(%arg0: i32, %arg1: i32) -> (i32, i32) {
    %c0_i32 = arith.constant 0 : i32
    %c0_i32_0 = arith.constant 0 : i32
    %c0_i32_1 = arith.constant 0 : i32
    return %c0_i32, %c0_i32_0 : i32, i32
  }
  func.func @transform_3(%arg0: i32, %arg1: i32) -> (i32, i32) {
    %c0_i32 = arith.constant 0 : i32
    %c0_i32_0 = arith.constant 0 : i32
    %c0_i32_1 = arith.constant 0 : i32
    return %c0_i32, %c0_i32_0 : i32, i32
  }
  func.func @transform_4(%arg0: i32, %arg1: i32) -> (i32, i32) {
    %c0_i32 = arith.constant 0 : i32
    %c0_i32_0 = arith.constant 0 : i32
    %c0_i32_1 = arith.constant 0 : i32
    return %c0_i32, %c0_i32_0 : i32, i32
  }
  func.func @transform_5(%arg0: i32, %arg1: i32) -> (i32, i32) {
    %c0_i32 = arith.constant 0 : i32
    %c0_i32_0 = arith.constant 0 : i32
    return %c0_i32, %arg1 : i32, i32
  }
  func.func @transform_6(%arg0: i32, %arg1: i32) -> (i32, i32) {
    %c0_i32 = arith.constant 0 : i32
    %c0_i32_0 = arith.constant 0 : i32
    return %c0_i32, %arg1 : i32, i32
  }
  func.func @transform_7(%arg0: i32, %arg1: i32) -> (i32, i32) {
    %c0_i32 = arith.constant 0 : i32
    return %arg0, %arg1 : i32, i32
  }
}

module attributes {stable_mosaic.version = 11 : i64} {
  func.func @_encoder_layer_kernel(%arg0: i32, %arg1: memref<1x8x32xf32, #tpu.memory_space<vmem>>, %arg2: memref<32x96xf32, #tpu.memory_space<vmem>>, %arg3: memref<1x96xf32, #tpu.memory_space<vmem>>, %arg4: memref<32x32xf32, #tpu.memory_space<vmem>>, %arg5: memref<1x32xf32, #tpu.memory_space<vmem>>, %arg6: memref<1x32xf32, #tpu.memory_space<vmem>>, %arg7: memref<1x32xf32, #tpu.memory_space<vmem>>, %arg8: memref<32x64xf32, #tpu.memory_space<vmem>>, %arg9: memref<1x64xf32, #tpu.memory_space<vmem>>, %arg10: memref<64x32xf32, #tpu.memory_space<vmem>>, %arg11: memref<1x32xf32, #tpu.memory_space<vmem>>, %arg12: memref<1x32xf32, #tpu.memory_space<vmem>>, %arg13: memref<1x32xf32, #tpu.memory_space<vmem>>, %arg14: memref<1x8x32xf32, #tpu.memory_space<vmem>>, %arg15: memref<8x32xf32, #tpu.memory_space<vmem>>) attributes {dimension_semantics = [#tpu.dimension_semantics<parallel>], iteration_bounds = array<i64: 2>, scalar_prefetch = 0 : i64, scratch_operands = 1 : i64, tpu.core_type = #tpu.core_type<tc>, window_params = [{transform_indices = @transform_0, window_bounds = array<i64: 1, 8, 32>}, {pipeline_mode = #tpu.pipeline_mode<synchronous>, transform_indices = @transform_1, window_bounds = array<i64: 32, 96>}, {pipeline_mode = #tpu.pipeline_mode<synchronous>, transform_indices = @transform_2, window_bounds = array<i64: 1, 96>}, {pipeline_mode = #tpu.pipeline_mode<synchronous>, transform_indices = @transform_3, window_bounds = array<i64: 32, 32>}, {pipeline_mode = #tpu.pipeline_mode<synchronous>, transform_indices = @transform_4, window_bounds = array<i64: 1, 32>}, {pipeline_mode = #tpu.pipeline_mode<synchronous>, transform_indices = @transform_5, window_bounds = array<i64: 1, 32>}, {pipeline_mode = #tpu.pipeline_mode<synchronous>, transform_indices = @transform_6, window_bounds = array<i64: 1, 32>}, {pipeline_mode = #tpu.pipeline_mode<synchronous>, transform_indices = @transform_7, window_bounds = array<i64: 32, 64>}, {pipeline_mode = #tpu.pipeline_mode<synchronous>, transform_indices = @transform_8, window_bounds = array<i64: 1, 64>}, {pipeline_mode = #tpu.pipeline_mode<synchronous>, transform_indices = @transform_9, window_bounds = array<i64: 64, 32>}, {pipeline_mode = #tpu.pipeline_mode<synchronous>, transform_indices = @transform_10, window_bounds = array<i64: 1, 32>}, {pipeline_mode = #tpu.pipeline_mode<synchronous>, transform_indices = @transform_11, window_bounds = array<i64: 1, 32>}, {pipeline_mode = #tpu.pipeline_mode<synchronous>, transform_indices = @transform_12, window_bounds = array<i64: 1, 32>}, {transform_indices = @transform_13, window_bounds = array<i64: 1, 8, 32>}]} {
    %c0 = arith.constant 0 : index
    %c0_0 = arith.constant 0 : index
    %c0_1 = arith.constant 0 : index
    %0 = vector.load %arg1[%c0, %c0_0, %c0_1] : memref<1x8x32xf32, #tpu.memory_space<vmem>>, vector<1x8x32xf32>
    %1 = vector.shape_cast %0 : vector<1x8x32xf32> to vector<8x32xf32>
    %c0_2 = arith.constant 0 : index
    %c0_3 = arith.constant 0 : index
    %2 = vector.load %arg2[%c0_2, %c0_3] : memref<32x96xf32, #tpu.memory_space<vmem>>, vector<32x96xf32>
    %cst = arith.constant dense<0.000000e+00> : vector<8x96xf32>
    %3 = tpu.matmul %1, %2, %cst {dimension_numbers = #tpu.dot_dimension_numbers<[1], [0], [0], [1], [0, 0, 1, 1], [], []>} : vector<8x32xf32>, vector<32x96xf32>, vector<8x96xf32> -> vector<8x96xf32>
    %c0_4 = arith.constant 0 : index
    %c0_5 = arith.constant 0 : index
    %4 = vector.load %arg3[%c0_4, %c0_5] : memref<1x96xf32, #tpu.memory_space<vmem>>, vector<1x96xf32>
    %5 = vector.broadcast %4 : vector<1x96xf32> to vector<8x96xf32>
    %6 = arith.addf %3, %5 : vector<8x96xf32>
    %7 = vector.extract_strided_slice %6 {offsets = [0, 0], sizes = [8, 16], strides = [1, 1]} : vector<8x96xf32> to vector<8x16xf32>
    %cst_6 = arith.constant 2.500000e-01 : f32
    %8 = vector.broadcast %cst_6 : f32 to vector<8x16xf32>
    %9 = arith.mulf %7, %8 : vector<8x16xf32>
    %10 = vector.extract_strided_slice %6 {offsets = [0, 32], sizes = [8, 16], strides = [1, 1]} : vector<8x96xf32> to vector<8x16xf32>
    %11 = vector.extract_strided_slice %6 {offsets = [0, 64], sizes = [8, 16], strides = [1, 1]} : vector<8x96xf32> to vector<8x16xf32>
    %cst_7 = arith.constant dense<0.000000e+00> : vector<8x8xf32>
    %12 = tpu.matmul %9, %10, %cst_7 {dimension_numbers = #tpu.dot_dimension_numbers<[1], [1], [0], [0], [0, 0, 1, 0], [], []>} : vector<8x16xf32>, vector<8x16xf32>, vector<8x8xf32> -> vector<8x8xf32>
    %cst_8 = arith.constant dense<0xFF800000> : vector<8xf32>
    %13 = vector.multi_reduction <maximumf>, %12, %cst_8 [1] : vector<8x8xf32> to vector<8xf32>
    %14 = vector.shape_cast %13 : vector<8xf32> to vector<8x1xf32>
    %15 = vector.broadcast %14 : vector<8x1xf32> to vector<8x8xf32>
    %16 = arith.subf %12, %15 : vector<8x8xf32>
    %17 = math.exp %16 : vector<8x8xf32>
    %cst_9 = arith.constant dense<0.000000e+00> : vector<8xf32>
    %18 = vector.multi_reduction <add>, %17, %cst_9 [1] : vector<8x8xf32> to vector<8xf32>
    %19 = vector.shape_cast %18 : vector<8xf32> to vector<8x1xf32>
    %20 = tpu.reciprocal %19 {approx = true} : vector<8x1xf32> -> vector<8x1xf32>
    %21 = vector.broadcast %20 : vector<8x1xf32> to vector<8x8xf32>
    %22 = arith.mulf %17, %21 : vector<8x8xf32>
    %cst_10 = arith.constant dense<0.000000e+00> : vector<8x16xf32>
    %23 = tpu.matmul %22, %11, %cst_10 {dimension_numbers = #tpu.dot_dimension_numbers<[1], [0], [0], [1], [0, 0, 1, 1], [], []>} : vector<8x8xf32>, vector<8x16xf32>, vector<8x16xf32> -> vector<8x16xf32>
    %c0_11 = arith.constant 0 : index
    %c0_12 = arith.constant 0 : index
    %24 = vector.load %arg15[%c0_11, %c0_12] : memref<8x32xf32, #tpu.memory_space<vmem>>, vector<8x16xf32>
    tpu.vector_store %arg15[%c0_11, %c0_12], %23 {strides = array<i32>} : memref<8x32xf32, #tpu.memory_space<vmem>>, vector<8x16xf32>,
    %25 = vector.extract_strided_slice %6 {offsets = [0, 16], sizes = [8, 16], strides = [1, 1]} : vector<8x96xf32> to vector<8x16xf32>
    %cst_13 = arith.constant 2.500000e-01 : f32
    %26 = vector.broadcast %cst_13 : f32 to vector<8x16xf32>
    %27 = arith.mulf %25, %26 : vector<8x16xf32>
    %28 = vector.extract_strided_slice %6 {offsets = [0, 48], sizes = [8, 16], strides = [1, 1]} : vector<8x96xf32> to vector<8x16xf32>
    %29 = vector.extract_strided_slice %6 {offsets = [0, 80], sizes = [8, 16], strides = [1, 1]} : vector<8x96xf32> to vector<8x16xf32>
    %cst_14 = arith.constant dense<0.000000e+00> : vector<8x8xf32>
    %30 = tpu.matmul %27, %28, %cst_14 {dimension_numbers = #tpu.dot_dimension_numbers<[1], [1], [0], [0], [0, 0, 1, 0], [], []>} : vector<8x16xf32>, vector<8x16xf32>, vector<8x8xf32> -> vector<8x8xf32>
    %cst_15 = arith.constant dense<0xFF800000> : vector<8xf32>
    %31 = vector.multi_reduction <maximumf>, %30, %cst_15 [1] : vector<8x8xf32> to vector<8xf32>
    %32 = vector.shape_cast %31 : vector<8xf32> to vector<8x1xf32>
    %33 = vector.broadcast %32 : vector<8x1xf32> to vector<8x8xf32>
    %34 = arith.subf %30, %33 : vector<8x8xf32>
    %35 = math.exp %34 : vector<8x8xf32>
    %cst_16 = arith.constant dense<0.000000e+00> : vector<8xf32>
    %36 = vector.multi_reduction <add>, %35, %cst_16 [1] : vector<8x8xf32> to vector<8xf32>
    %37 = vector.shape_cast %36 : vector<8xf32> to vector<8x1xf32>
    %38 = tpu.reciprocal %37 {approx = true} : vector<8x1xf32> -> vector<8x1xf32>
    %39 = vector.broadcast %38 : vector<8x1xf32> to vector<8x8xf32>
    %40 = arith.mulf %35, %39 : vector<8x8xf32>
    %cst_17 = arith.constant dense<0.000000e+00> : vector<8x16xf32>
    %41 = tpu.matmul %40, %29, %cst_17 {dimension_numbers = #tpu.dot_dimension_numbers<[1], [0], [0], [1], [0, 0, 1, 1], [], []>} : vector<8x8xf32>, vector<8x16xf32>, vector<8x16xf32> -> vector<8x16xf32>
    %c0_18 = arith.constant 0 : index
    %c16 = arith.constant 16 : index
    %42 = vector.load %arg15[%c0_18, %c16] : memref<8x32xf32, #tpu.memory_space<vmem>>, vector<8x16xf32>
    tpu.vector_store %arg15[%c0_18, %c16], %41 {strides = array<i32>} : memref<8x32xf32, #tpu.memory_space<vmem>>, vector<8x16xf32>,
    %c0_19 = arith.constant 0 : index
    %c0_20 = arith.constant 0 : index
    %43 = vector.load %arg15[%c0_19, %c0_20] : memref<8x32xf32, #tpu.memory_space<vmem>>, vector<8x32xf32>
    %c0_21 = arith.constant 0 : index
    %c0_22 = arith.constant 0 : index
    %44 = vector.load %arg4[%c0_21, %c0_22] : memref<32x32xf32, #tpu.memory_space<vmem>>, vector<32x32xf32>
    %cst_23 = arith.constant dense<0.000000e+00> : vector<8x32xf32>
    %45 = tpu.matmul %43, %44, %cst_23 {dimension_numbers = #tpu.dot_dimension_numbers<[1], [0], [0], [1], [0, 0, 1, 1], [], []>} : vector<8x32xf32>, vector<32x32xf32>, vector<8x32xf32> -> vector<8x32xf32>
    %c0_24 = arith.constant 0 : index
    %c0_25 = arith.constant 0 : index
    %46 = vector.load %arg5[%c0_24, %c0_25] : memref<1x32xf32, #tpu.memory_space<vmem>>, vector<1x32xf32>
    %47 = vector.broadcast %46 : vector<1x32xf32> to vector<8x32xf32>
    %48 = arith.addf %45, %47 : vector<8x32xf32>
    %49 = arith.addf %1, %48 : vector<8x32xf32>
    %c0_26 = arith.constant 0 : index
    %c0_27 = arith.constant 0 : index
    %50 = vector.load %arg6[%c0_26, %c0_27] : memref<1x32xf32, #tpu.memory_space<vmem>>, vector<1x32xf32>
    %c0_28 = arith.constant 0 : index
    %c0_29 = arith.constant 0 : index
    %51 = vector.load %arg7[%c0_28, %c0_29] : memref<1x32xf32, #tpu.memory_space<vmem>>, vector<1x32xf32>
    %cst_30 = arith.constant dense<0.000000e+00> : vector<8xf32>
    %52 = vector.multi_reduction <add>, %49, %cst_30 [1] : vector<8x32xf32> to vector<8xf32>
    %53 = vector.shape_cast %52 : vector<8xf32> to vector<8x1xf32>
    %cst_31 = arith.constant 3.200000e+01 : f32
    %54 = vector.broadcast %cst_31 : f32 to vector<8x1xf32>
    %55 = arith.divf %53, %54 : vector<8x1xf32>
    %56 = vector.broadcast %55 : vector<8x1xf32> to vector<8x32xf32>
    %57 = arith.subf %49, %56 : vector<8x32xf32>
    %58 = arith.mulf %57, %57 : vector<8x32xf32>
    %cst_32 = arith.constant dense<0.000000e+00> : vector<8xf32>
    %59 = vector.multi_reduction <add>, %58, %cst_32 [1] : vector<8x32xf32> to vector<8xf32>
    %60 = vector.shape_cast %59 : vector<8xf32> to vector<8x1xf32>
    %cst_33 = arith.constant 3.200000e+01 : f32
    %61 = vector.broadcast %cst_33 : f32 to vector<8x1xf32>
    %62 = arith.divf %60, %61 : vector<8x1xf32>
    %cst_34 = arith.constant 9.99999974E-6 : f32
    %63 = vector.broadcast %cst_34 : f32 to vector<8x1xf32>
    %64 = arith.addf %62, %63 : vector<8x1xf32>
    %65 = math.rsqrt %64 : vector<8x1xf32>
    %66 = vector.broadcast %65 : vector<8x1xf32> to vector<8x32xf32>
    %67 = arith.mulf %57, %66 : vector<8x32xf32>
    %68 = vector.broadcast %50 : vector<1x32xf32> to vector<8x32xf32>
    %69 = arith.mulf %67, %68 : vector<8x32xf32>
    %70 = vector.broadcast %51 : vector<1x32xf32> to vector<8x32xf32>
    %71 = arith.addf %69, %70 : vector<8x32xf32>
    %c0_35 = arith.constant 0 : index
    %c0_36 = arith.constant 0 : index
    %72 = vector.load %arg8[%c0_35, %c0_36] : memref<32x64xf32, #tpu.memory_space<vmem>>, vector<32x64xf32>
    %cst_37 = arith.constant dense<0.000000e+00> : vector<8x64xf32>
    %73 = tpu.matmul %71, %72, %cst_37 {dimension_numbers = #tpu.dot_dimension_numbers<[1], [0], [0], [1], [0, 0, 1, 1], [], []>} : vector<8x32xf32>, vector<32x64xf32>, vector<8x64xf32> -> vector<8x64xf32>
    %c0_38 = arith.constant 0 : index
    %c0_39 = arith.constant 0 : index
    %74 = vector.load %arg9[%c0_38, %c0_39] : memref<1x64xf32, #tpu.memory_space<vmem>>, vector<1x64xf32>
    %75 = vector.broadcast %74 : vector<1x64xf32> to vector<8x64xf32>
    %76 = arith.addf %73, %75 : vector<8x64xf32>
    %cst_40 = arith.constant 5.000000e-01 : f32
    %77 = vector.broadcast %cst_40 : f32 to vector<8x64xf32>
    %78 = arith.mulf %77, %76 : vector<8x64xf32>
    %cst_41 = arith.constant 0.707106769 : f32
    %79 = vector.broadcast %cst_41 : f32 to vector<8x64xf32>
    %80 = arith.mulf %76, %79 : vector<8x64xf32>
    %81 = math.absf %80 : vector<8x64xf32>
    %cst_42 = arith.constant 0.327591091 : f32
    %82 = vector.broadcast %cst_42 : f32 to vector<8x64xf32>
    %83 = arith.mulf %82, %81 : vector<8x64xf32>
    %cst_43 = arith.constant 1.000000e+00 : f32
    %84 = vector.broadcast %cst_43 : f32 to vector<8x64xf32>
    %85 = arith.addf %84, %83 : vector<8x64xf32>
    %cst_44 = arith.constant 1.000000e+00 : f32
    %86 = vector.broadcast %cst_44 : f32 to vector<8x64xf32>
    %87 = arith.divf %86, %85 : vector<8x64xf32>
    %cst_45 = arith.constant 1.06140542 : f32
    %88 = vector.broadcast %cst_45 : f32 to vector<8x64xf32>
    %89 = arith.mulf %87, %88 : vector<8x64xf32>
    %cst_46 = arith.constant -1.45315206 : f32
    %90 = vector.broadcast %cst_46 : f32 to vector<8x64xf32>
    %91 = arith.addf %90, %89 : vector<8x64xf32>
    %92 = arith.mulf %87, %91 : vector<8x64xf32>
    %cst_47 = arith.constant 1.42141378 : f32
    %93 = vector.broadcast %cst_47 : f32 to vector<8x64xf32>
    %94 = arith.addf %93, %92 : vector<8x64xf32>
    %95 = arith.mulf %87, %94 : vector<8x64xf32>
    %cst_48 = arith.constant -0.284496725 : f32
    %96 = vector.broadcast %cst_48 : f32 to vector<8x64xf32>
    %97 = arith.addf %96, %95 : vector<8x64xf32>
    %98 = arith.mulf %87, %97 : vector<8x64xf32>
    %cst_49 = arith.constant 0.254829586 : f32
    %99 = vector.broadcast %cst_49 : f32 to vector<8x64xf32>
    %100 = arith.addf %99, %98 : vector<8x64xf32>
    %101 = arith.mulf %87, %100 : vector<8x64xf32>
    %102 = arith.mulf %81, %81 : vector<8x64xf32>
    %cst_50 = arith.constant 0.000000e+00 : f32
    %103 = vector.broadcast %cst_50 : f32 to vector<8x64xf32>
    %104 = arith.subf %103, %102 : vector<8x64xf32>
    %105 = math.exp %104 : vector<8x64xf32>
    %106 = arith.mulf %101, %105 : vector<8x64xf32>
    %cst_51 = arith.constant 1.000000e+00 : f32
    %107 = vector.broadcast %cst_51 : f32 to vector<8x64xf32>
    %108 = arith.subf %107, %106 : vector<8x64xf32>
    %cst_52 = arith.constant 0.000000e+00 : f32
    %109 = vector.broadcast %cst_52 : f32 to vector<8x64xf32>
    %110 = arith.cmpf oge, %80, %109 : vector<8x64xf32>
    %cst_53 = arith.constant 0.000000e+00 : f32
    %111 = vector.broadcast %cst_53 : f32 to vector<8x64xf32>
    %112 = arith.subf %111, %108 : vector<8x64xf32>
    %113 = arith.select %110, %108, %112 : vector<8x64xi1>, vector<8x64xf32>
    %cst_54 = arith.constant 1.000000e+00 : f32
    %114 = vector.broadcast %cst_54 : f32 to vector<8x64xf32>
    %115 = arith.addf %114, %113 : vector<8x64xf32>
    %116 = arith.mulf %78, %115 : vector<8x64xf32>
    %c0_55 = arith.constant 0 : index
    %c0_56 = arith.constant 0 : index
    %117 = vector.load %arg10[%c0_55, %c0_56] : memref<64x32xf32, #tpu.memory_space<vmem>>, vector<64x32xf32>
    %cst_57 = arith.constant dense<0.000000e+00> : vector<8x32xf32>
    %118 = tpu.matmul %116, %117, %cst_57 {dimension_numbers = #tpu.dot_dimension_numbers<[1], [0], [0], [1], [0, 0, 1, 1], [], []>} : vector<8x64xf32>, vector<64x32xf32>, vector<8x32xf32> -> vector<8x32xf32>
    %c0_58 = arith.constant 0 : index
    %c0_59 = arith.constant 0 : index
    %119 = vector.load %arg11[%c0_58, %c0_59] : memref<1x32xf32, #tpu.memory_space<vmem>>, vector<1x32xf32>
    %120 = vector.broadcast %119 : vector<1x32xf32> to vector<8x32xf32>
    %121 = arith.addf %118, %120 : vector<8x32xf32>
    %122 = arith.addf %71, %121 : vector<8x32xf32>
    %c0_60 = arith.constant 0 : index
    %c0_61 = arith.constant 0 : index
    %123 = vector.load %arg12[%c0_60, %c0_61] : memref<1x32xf32, #tpu.memory_space<vmem>>, vector<1x32xf32>
    %c0_62 = arith.constant 0 : index
    %c0_63 = arith.constant 0 : index
    %124 = vector.load %arg13[%c0_62, %c0_63] : memref<1x32xf32, #tpu.memory_space<vmem>>, vector<1x32xf32>
    %cst_64 = arith.constant dense<0.000000e+00> : vector<8xf32>
    %125 = vector.multi_reduction <add>, %122, %cst_64 [1] : vector<8x32xf32> to vector<8xf32>
    %126 = vector.shape_cast %125 : vector<8xf32> to vector<8x1xf32>
    %cst_65 = arith.constant 3.200000e+01 : f32
    %127 = vector.broadcast %cst_65 : f32 to vector<8x1xf32>
    %128 = arith.divf %126, %127 : vector<8x1xf32>
    %129 = vector.broadcast %128 : vector<8x1xf32> to vector<8x32xf32>
    %130 = arith.subf %122, %129 : vector<8x32xf32>
    %131 = arith.mulf %130, %130 : vector<8x32xf32>
    %cst_66 = arith.constant dense<0.000000e+00> : vector<8xf32>
    %132 = vector.multi_reduction <add>, %131, %cst_66 [1] : vector<8x32xf32> to vector<8xf32>
    %133 = vector.shape_cast %132 : vector<8xf32> to vector<8x1xf32>
    %cst_67 = arith.constant 3.200000e+01 : f32
    %134 = vector.broadcast %cst_67 : f32 to vector<8x1xf32>
    %135 = arith.divf %133, %134 : vector<8x1xf32>
    %cst_68 = arith.constant 9.99999974E-6 : f32
    %136 = vector.broadcast %cst_68 : f32 to vector<8x1xf32>
    %137 = arith.addf %135, %136 : vector<8x1xf32>
    %138 = math.rsqrt %137 : vector<8x1xf32>
    %139 = vector.broadcast %138 : vector<8x1xf32> to vector<8x32xf32>
    %140 = arith.mulf %130, %139 : vector<8x32xf32>
    %141 = vector.broadcast %123 : vector<1x32xf32> to vector<8x32xf32>
    %142 = arith.mulf %140, %141 : vector<8x32xf32>
    %143 = vector.broadcast %124 : vector<1x32xf32> to vector<8x32xf32>
    %144 = arith.addf %142, %143 : vector<8x32xf32>
    %c0_69 = arith.constant 0 : index
    %c0_70 = arith.constant 0 : index
    %c0_71 = arith.constant 0 : index
    %145 = vector.load %arg14[%c0_69, %c0_70, %c0_71] : memref<1x8x32xf32, #tpu.memory_space<vmem>>, vector<1x8x32xf32>
    %146 = vector.shape_cast %145 : vector<1x8x32xf32> to vector<8x32xf32>
    %147 = vector.shape_cast %144 : vector<8x32xf32> to vector<1x8x32xf32>
    tpu.vector_store %arg14[%c0_69, %c0_70, %c0_71], %147 {strides = array<i32>} : memref<1x8x32xf32, #tpu.memory_space<vmem>>, vector<1x8x32xf32>,
    return
  }
  func.func @transform_0(%arg0: i32) -> (i32, i32, i32) {
    %c0_i32 = arith.constant 0 : i32
    %c0_i32_0 = arith.constant 0 : i32
    %c0_i32_1 = arith.constant 0 : i32
    return %arg0, %c0_i32, %c0_i32_0 : i32, i32, i32
  }
  func.func @transform_1(%arg0: i32) -> (i32, i32) {
    %c0_i32 = arith.constant 0 : i32
    %c0_i32_0 = arith.constant 0 : i32
    %c0_i32_1 = arith.constant 0 : i32
    return %c0_i32, %c0_i32_0 : i32, i32
  }
  func.func @transform_2(%arg0: i32) -> (i32, i32) {
    %c0_i32 = arith.constant 0 : i32
    %c0_i32_0 = arith.constant 0 : i32
    %c0_i32_1 = arith.constant 0 : i32
    return %c0_i32, %c0_i32_0 : i32, i32
  }
  func.func @transform_3(%arg0: i32) -> (i32, i32) {
    %c0_i32 = arith.constant 0 : i32
    %c0_i32_0 = arith.constant 0 : i32
    %c0_i32_1 = arith.constant 0 : i32
    return %c0_i32, %c0_i32_0 : i32, i32
  }
  func.func @transform_4(%arg0: i32) -> (i32, i32) {
    %c0_i32 = arith.constant 0 : i32
    %c0_i32_0 = arith.constant 0 : i32
    %c0_i32_1 = arith.constant 0 : i32
    return %c0_i32, %c0_i32_0 : i32, i32
  }
  func.func @transform_5(%arg0: i32) -> (i32, i32) {
    %c0_i32 = arith.constant 0 : i32
    %c0_i32_0 = arith.constant 0 : i32
    %c0_i32_1 = arith.constant 0 : i32
    return %c0_i32, %c0_i32_0 : i32, i32
  }
  func.func @transform_6(%arg0: i32) -> (i32, i32) {
    %c0_i32 = arith.constant 0 : i32
    %c0_i32_0 = arith.constant 0 : i32
    %c0_i32_1 = arith.constant 0 : i32
    return %c0_i32, %c0_i32_0 : i32, i32
  }
  func.func @transform_7(%arg0: i32) -> (i32, i32) {
    %c0_i32 = arith.constant 0 : i32
    %c0_i32_0 = arith.constant 0 : i32
    %c0_i32_1 = arith.constant 0 : i32
    return %c0_i32, %c0_i32_0 : i32, i32
  }
  func.func @transform_8(%arg0: i32) -> (i32, i32) {
    %c0_i32 = arith.constant 0 : i32
    %c0_i32_0 = arith.constant 0 : i32
    %c0_i32_1 = arith.constant 0 : i32
    return %c0_i32, %c0_i32_0 : i32, i32
  }
  func.func @transform_9(%arg0: i32) -> (i32, i32) {
    %c0_i32 = arith.constant 0 : i32
    %c0_i32_0 = arith.constant 0 : i32
    %c0_i32_1 = arith.constant 0 : i32
    return %c0_i32, %c0_i32_0 : i32, i32
  }
  func.func @transform_10(%arg0: i32) -> (i32, i32) {
    %c0_i32 = arith.constant 0 : i32
    %c0_i32_0 = arith.constant 0 : i32
    %c0_i32_1 = arith.constant 0 : i32
    return %c0_i32, %c0_i32_0 : i32, i32
  }
  func.func @transform_11(%arg0: i32) -> (i32, i32) {
    %c0_i32 = arith.constant 0 : i32
    %c0_i32_0 = arith.constant 0 : i32
    %c0_i32_1 = arith.constant 0 : i32
    return %c0_i32, %c0_i32_0 : i32, i32
  }
  func.func @transform_12(%arg0: i32) -> (i32, i32) {
    %c0_i32 = arith.constant 0 : i32
    %c0_i32_0 = arith.constant 0 : i32
    %c0_i32_1 = arith.constant 0 : i32
    return %c0_i32, %c0_i32_0 : i32, i32
  }
  func.func @transform_13(%arg0: i32) -> (i32, i32, i32) {
    %c0_i32 = arith.constant 0 : i32
    %c0_i32_0 = arith.constant 0 : i32
    %c0_i32_1 = arith.constant 0 : i32
    return %arg0, %c0_i32, %c0_i32_0 : i32, i32, i32
  }
}

</mosaic_0001>

<bundles_post_ra>
// kernel: mlm_task_forward.4
= control target key start
LH: loop header
LB: loop body
LE: loop exit
PB: predicated region body
PF: predicated region fallthrough
CT: control target
= control target key end

     0   :  { %vm18_vm0 = vcmask 261120   ;;  %s118_s0 = inlined_call_operand.vmem [shape: f32[16,32], index: 0, kind: input, shape index: {}]   ;;  %s119_s1 = inlined_call_operand.vmem [shape: f32[1,32], index: 1, kind: input, shape index: {}]   ;;  %s120_s2 = inlined_call_operand.vmem [shape: f32[1,32], index: 2, kind: input, shape index: {}]   ;;  %s121_s3 = inlined_call_operand.vmem [shape: f32[16,32], index: 3, kind: output, shape index: {}]  }
   0x1   :  { %v14_v0 = vld [vmem:[%s118_s0] sm:$0xff]  ;;  %v15_v1 = vld [vmem:[%s118_s0 + $0x8] sm:$0xff] }
   0x2   :  { %v19_v2 = vsel %vm18_vm0, %v14_v0, 0.0  ;;  %v22_v3 = vsel %vm18_vm0, %v15_v1, 0.0  ;;  %v68_v21 = vld [vmem:[%s119_s1] ss:$0 sm:$0xff] }
   0x3   :  { %20 = vadd.xlane.f32.xlu0 %v19_v2  ;;  %v69_v23 = vld [vmem:[%s120_s2] ss:$0 sm:$0xff] }
   0x7   :  { %23 = vadd.xlane.f32.xlu0 %v22_v3 }
  0x8c   :  { %v21_v4 = vpop.xlane.xlu0 %20 }
  0x8d   :  { %v26_v5 = vmul.f32 0.03125, %v21_v4 }
  0x8f   :  { %v28_v6 = vsub.f32 %v14_v0, %v26_v5 }
  0x90   :  { %v24_v7 = vpop.xlane.xlu0 %23 }
  0x91   :  { %v27_v8 = vmul.f32 0.03125, %v24_v7  ;;  %v30_v9 = vmul.f32 %v28_v6, %v28_v6 }
  0x93   :  { %v29_v10 = vsub.f32 %v15_v1, %v27_v8  ;;  %v32_v11 = vsel %vm18_vm0, %v30_v9, 0.0 }
  0x94   :  { %33 = vadd.xlane.f32.xlu1 %v32_v11 }
  0x95   :  { %v31_v12 = vmul.f32 %v29_v10, %v29_v10 }
  0x97   :  { %v35_v13 = vsel %vm18_vm0, %v31_v12, 0.0 }
  0x98   :  { %36 = vadd.xlane.f32.xlu1 %v35_v13 }
 0x11d   :  { %v34_v14 = vpop.xlane.xlu1 %33 }
 0x11e   :  { %v38_v15 = vmul.f32 0.03125, %v34_v14 }
 0x120   :  { %v40_v16 = vadd.f32 1e-05, %v38_v15 }
 0x121   :  { %v37_v17 = vpop.xlane.xlu1 %36 }
 0x122   :  { %70 = vrsqrt.f32 %v40_v16  ;;  %v39_v18 = vmul.f32 0.03125, %v37_v17 }
 0x124   :  { %v41_v19 = vadd.f32 1e-05, %v39_v18 }
 0x126   :  { %72 = vrsqrt.f32 %v41_v19 }
 0x12f   :  { %v71_v20 = vpop.eup %70 }
 0x130   :  { %v44_v22 = vmul.f32 %v71_v20, %v28_v6 }
 0x132   :  { %v52_v24 = vmul.f32 %v68_v21, %v44_v22 }
 0x133   :  { %v73_v25 = vpop.eup %72 }
 0x134   :  { %v60_v26 = vadd.f32 %v69_v23, %v52_v24  ;;  %v45_v27 = vmul.f32 %v73_v25, %v29_v10 }
 0x136   :  { %62 = vst.msk [vmem:[%s121_s3] sm:$0xff] %vm18_vm0, %v60_v26  ;;  %v53_v28 = vmul.f32 %v68_v21, %v45_v27 }
 0x138   :  { %v61_v29 = vadd.f32 %v69_v23, %v53_v28 }
 0x13a   :  { %63 = vst.msk [vmem:[%s121_s3 + $0x8] sm:$0xff] %vm18_vm0, %v61_v29 }

// kernel: mlm_task_forward.7
= control target key start
LH: loop header
LB: loop body
LE: loop exit
PB: predicated region body
PF: predicated region fallthrough
CT: control target
= control target key end

     0   :  { %vm44_vm0 = vcmask 261120   ;;  %s517_s0 = inlined_call_operand.vmem [shape: f32[16,32], index: 0, kind: input, shape index: {}]   ;;  %s518_s1 = inlined_call_operand.vmem [shape: f32[32,32], index: 1, kind: input, shape index: {}]   ;;  %s519_s2 = inlined_call_operand.vmem [shape: f32[1,32], index: 2, kind: input, shape index: {}]   ;;  %s520_s3 = inlined_call_operand.vmem [shape: f32[1,32], index: 3, kind: input, shape index: {}]   ;;  %s521_s4 = inlined_call_operand.vmem [shape: f32[1,32], index: 4, kind: input, shape index: {}]   ;;  %s522_s5 = inlined_call_operand.vmem [shape: f32[32,128], index: 5, kind: input, shape index: {}]   ;;  %s523_s6 = inlined_call_operand.vmem [shape: f32[1,128], index: 6, kind: input, shape index: {}]   ;;  %s524_s7 = inlined_call_operand.hbm [shape: f32[16,128], index: 7, kind: output, shape index: {}]  }
   0x1   :  { %v36_v0 = vld [vmem:[%s518_s1 + $0x18] sm:$0xff]  ;;  %v35_v1 = vld [vmem:[%s518_s1 + $0x10] sm:$0xff]  ;;  %v31_v2 = vld [vmem:[%s517_s0] sm:$0xff] }
   0x2   :  { %360 = vmatprep.subr.mxu0 %v36_v0  ;;  %v34_v3 = vld [vmem:[%s518_s1 + $0x8] sm:$0xff]  ;;  %368 = vmatprep.mubr.msk.f32.mxu0 %vm44_vm0, %v31_v2 }
   0x3   :  { %361 = vmatpush3.msra.mxu0 %v36_v0 }
   0x4   :  { %12 = vsyncpa [#allocation4], 0  ;;  %362 = vmatprep.subr.mxu0 %v35_v1  ;;  %v33_v4 = vld [vmem:[%s518_s1] sm:$0xff]  ;;  %v32_v5 = vld [vmem:[%s517_s0 + $0x8] sm:$0xff] }
   0x5   :  { %363 = vmatpush3.msra.mxu0 %v35_v1  ;;  %v340_v6 = vld [vmem:[%s519_s2] ss:$0 sm:$0xff] }
   0x6   :  { %364 = vmatprep.subr.mxu0 %v34_v3 }
   0x7   :  { %365 = vmatpush3.msra.mxu0 %v34_v3 }
   0x8   :  { %366 = vmatprep.subr.mxu0 %v33_v4 }
   0x9   :  { %367 = vmatpush3.msra.mxu0 %v33_v4 }
   0xa   :  { %369 = vmatmul.mubr.msk.f32.vlgmr.msra.gmra.mxu0 %vm44_vm0, %v32_v5 }
  0xca   :  { %v370_v7 = vpop.f32.mrf.mxu0 }
  0xcb   :  { %v123_v8 = vadd.f32 %v370_v7, %v340_v6 }
  0xcc   :  { %v117_v9 = vpop.f32.mrf.mxu0 }
  0xcd   :  { %v129_v10 = vmul.f32 0.70710677, %v123_v8  ;;  %v118_v11 = vadd.f32 %v340_v6, %v117_v9  ;;  %v127_v58 = vmul.f32 0.5, %v123_v8  ;;  %v232_v9 = vld [vmem:[%s522_s5 + $0x18] sm:$0xff] }
  0xce   :  { %371 = vmatprep.subr.mxu1 %v232_v9 }
  0xcf   :  { %v131_v12 = vand.u32 2147483647, %v129_v10  ;;  %v128_v13 = vmul.f32 0.70710677, %v118_v11  ;;  %vm171_vm1 = vcmp.ge.f32.partialorder %v129_v10, 0.0  ;;  %v126_v55 = vmul.f32 0.5, %v118_v11  ;;  %372 = vmatpush3.msra.mxu1 %v232_v9 }
  0xd0   :  { %v231_v10 = vld [vmem:[%s522_s5 + $0x10] sm:$0xff]  ;;  %v230_v11 = vld [vmem:[%s522_s5 + $0x8] sm:$0xff] }
  0xd1   :  { %v133_v14 = vmul.f32 0.3275911, %v131_v12  ;;  %v130_v15 = vand.u32 2147483647, %v128_v13  ;;  %v159_v19 = vmul.f32 %v131_v12, %v131_v12  ;;  %vm170_vm2 = vcmp.ge.f32.partialorder %v128_v13, 0.0  ;;  %373 = vmatprep.subr.mxu1 %v231_v10  ;;  %v229_v12 = vld [vmem:[%s522_s5] sm:$0xff] }
  0xd2   :  { %374 = vmatpush3.msra.mxu1 %v231_v10 }
  0xd3   :  { %v135_v16 = vadd.f32 1.0, %v133_v14  ;;  %v132_v17 = vmul.f32 0.3275911, %v130_v15  ;;  %v158_v20 = vmul.f32 %v130_v15, %v130_v15  ;;  %v161_v21 = vsub.f32 0.0, %v159_v19  ;;  %375 = vmatprep.subr.mxu1 %v230_v11 }
  0xd4   :  { %376 = vmatpush3.msra.mxu1 %v230_v11 }
  0xd5   :  { %385 = vrcp.f32 %v135_v16  ;;  %v134_v18 = vadd.f32 1.0, %v132_v17  ;;  %v160_v23 = vsub.f32 0.0, %v158_v20  ;;  %v164_v24 = vmul.f32 1.442695, %v161_v21  ;;  %377 = vmatprep.subr.mxu1 %v229_v12  ;;  %v343_v20 = vld [vmem:[%s520_s3] ss:$0 sm:$0xff] }
  0xd6   :  { %378 = vmatpush3.msra.mxu1 %v229_v12 }
  0xd7   :  { %387 = vrcp.f32 %v134_v18  ;;  %v162_v28 = vmul.f32 1.442695, %v160_v23 }
  0xd8   :  { %389 = vpow2.f32 %v164_v24 }
  0xd9   :  { %391 = vpow2.f32 %v162_v28 }
  0xe2   :  { %v386_v22 = vpop.eup %385 }
  0xe3   :  { %v141_v25 = vmul.f32 1.0614054, %v386_v22 }
  0xe4   :  { %v388_v26 = vpop.eup %387 }
  0xe5   :  { %v143_v27 = vadd.f32 -1.4531521, %v141_v25  ;;  %v140_v29 = vmul.f32 1.0614054, %v388_v26  ;;  %v390_v43 = vpop.eup %389 }
  0xe6   :  { %v392_v47 = vpop.eup %391 }
  0xe7   :  { %v145_v30 = vmul.f32 %v386_v22, %v143_v27  ;;  %v142_v31 = vadd.f32 -1.4531521, %v140_v29 }
  0xe9   :  { %v147_v32 = vadd.f32 1.4214138, %v145_v30  ;;  %v144_v33 = vmul.f32 %v388_v26, %v142_v31  ;;  %v345_v31 = vld [vmem:[%s523_s6] ss:$0 sm:$0xff] }
  0xeb   :  { %v149_v34 = vmul.f32 %v386_v22, %v147_v32  ;;  %v146_v35 = vadd.f32 1.4214138, %v144_v33 }
  0xed   :  { %v151_v36 = vadd.f32 -0.28449672, %v149_v34  ;;  %v148_v37 = vmul.f32 %v388_v26, %v146_v35 }
  0xef   :  { %v153_v38 = vmul.f32 %v386_v22, %v151_v36  ;;  %v150_v39 = vadd.f32 -0.28449672, %v148_v37 }
  0xf1   :  { %v155_v40 = vadd.f32 0.2548296, %v153_v38  ;;  %v152_v41 = vmul.f32 %v388_v26, %v150_v39 }
  0xf3   :  { %v157_v42 = vmul.f32 %v386_v22, %v155_v40  ;;  %v154_v44 = vadd.f32 0.2548296, %v152_v41  ;;  %v344_v22 = vld [vmem:[%s521_s4] ss:$0 sm:$0xff]  ;;  %s419_s4 = smov [#allocation3]  }
  0xf4   :  { %s329_s24 = sshll.u32 %s419_s4, 4  ;;  %s330_s24 = int_to_ptr.vmem [resolvable:$true] %s329_s24 }
  0xf5   :  { %v167_v45 = vmul.f32 %v390_v43, %v157_v42  ;;  %v156_v46 = vmul.f32 %v388_v26, %v154_v44  ;;  %s397_s25 = scalar_lea.vmem %s330_s24, 256  ;;  %p402_p1 = scmp.lt.s32.totalorder %s330_s24, %s330_s24 }
  0xf6   :  { %p398_p0 = scmp.ne.s32.totalorder %s330_s24, %s397_s25  ;;  %p403_p2 = scmp.lt.s32.totalorder %s397_s25, %s397_s25 }
  0xf7   :  { %v169_v48 = vsub.f32 1.0, %v167_v45  ;;  %v166_v49 = vmul.f32 %v392_v47, %v156_v46 }
  0xf8   :  { %p404_p3 = por %p403_p2, %p402_p1 }
  0xf9   :  { %v173_v50 = vsub.f32 0.0, %v169_v48  ;;  %v168_v51 = vsub.f32 1.0, %v166_v49 }
  0xfa   :  { %p405_p4 = pnand %p404_p3, %p398_p0 }
  0xfb   :  { %v172_v52 = vsub.f32 0.0, %v168_v51  ;;  %v175_v53 = vsel %vm171_vm1, %v169_v48, %v173_v50 }
  0xfc   :  { %v177_v57 = vadd.f32 1.0, %v175_v53 }
  0xfd   :  { %v174_v54 = vsel %vm170_vm2, %v168_v51, %v172_v52 }
  0xfe   :  { %v176_v56 = vadd.f32 1.0, %v174_v54  ;;  %v179_v61 = vmul.f32 %v177_v57, %v127_v58 }
 0x100   :  { %v178_v59 = vmul.f32 %v176_v56, %v126_v55  ;;  %v185_v62 = vsel %vm44_vm0, %v179_v61, 0.0 }
 0x102   :  { %v182_v60 = vsel %vm44_vm0, %v178_v59, 0.0 }
 0x103   :  { %183 = vadd.xlane.f32.xlu0 %v182_v60 }
 0x107   :  { %186 = vadd.xlane.f32.xlu0 %v185_v62 }
 0x18c   :  { %v184_v63 = vpop.xlane.xlu0 %183 }
 0x18d   :  { %v189_v0 = vmul.f32 0.03125, %v184_v63 }
 0x18f   :  { %v191_v1 = vsub.f32 %v178_v59, %v189_v0 }
 0x190   :  { %v187_v2 = vpop.xlane.xlu0 %186 }
 0x191   :  { %v190_v3 = vmul.f32 0.03125, %v187_v2  ;;  %v193_v4 = vmul.f32 %v191_v1, %v191_v1 }
 0x193   :  { %v192_v5 = vsub.f32 %v179_v61, %v190_v3  ;;  %v195_v6 = vsel %vm44_vm0, %v193_v4, 0.0 }
 0x194   :  { %196 = vadd.xlane.f32.xlu1 %v195_v6 }
 0x195   :  { %v194_v7 = vmul.f32 %v192_v5, %v192_v5 }
 0x197   :  { %v198_v8 = vsel %vm44_vm0, %v194_v7, 0.0 }
 0x198   :  { %199 = vadd.xlane.f32.xlu1 %v198_v8 }
 0x21d   :  { %v197_v13 = vpop.xlane.xlu1 %196 }
 0x21e   :  { %v201_v14 = vmul.f32 0.03125, %v197_v13 }
 0x220   :  { %v203_v15 = vadd.f32 1e-12, %v201_v14 }
 0x221   :  { %v200_v16 = vpop.xlane.xlu1 %199 }
 0x222   :  { %393 = vrsqrt.f32 %v203_v15  ;;  %v202_v17 = vmul.f32 0.03125, %v200_v16 }
 0x224   :  { %v204_v18 = vadd.f32 1e-12, %v202_v17 }
 0x226   :  { %395 = vrsqrt.f32 %v204_v18 }
 0x22f   :  { %v394_v19 = vpop.eup %393 }
 0x230   :  { %v207_v21 = vmul.f32 %v394_v19, %v191_v1 }
 0x232   :  { %v215_v23 = vmul.f32 %v343_v20, %v207_v21 }
 0x233   :  { %v396_v24 = vpop.eup %395 }
 0x234   :  { %v223_v25 = vadd.f32 %v344_v22, %v215_v23  ;;  %v208_v26 = vmul.f32 %v396_v24, %v192_v5 }
 0x236   :  { %225 = vst.msk [vmem:[#allocation2] sm:$0xff] %vm44_vm0, %v223_v25  ;;  %v216_v27 = vmul.f32 %v343_v20, %v208_v26 }
 0x238   :  { %v224_v28 = vadd.f32 %v344_v22, %v216_v27 }
 0x23a   :  { %226 = vst.msk [vmem:[#allocation2 + $0x8] sm:$0xff] %vm44_vm0, %v224_v28 }
 0x23d   :  { %v227_v29 = vld [vmem:[#allocation2] sm:$0xff] }
 0x23e   :  { %379 = vmatprep.mubr.msk.f32.mxu1 %vm44_vm0, %v227_v29 }
 0x241   :  { %v228_v30 = vld [vmem:[#allocation2 + $0x8] sm:$0xff] }
 0x242   :  { %380 = vmatmul.mubr.msk.f32.vlgmr.msra.gmra.mxu1 %vm44_vm0, %v228_v30 }
 0x302   :  { %v381_v32 = vpop.f32.mrf.mxu1 }
 0x303   :  { %v319_v33 = vadd.f32 %v381_v32, %v345_v31 }
 0x304   :  { %v313_v34 = vpop.f32.mrf.mxu1 }
 0x305   :  { %323 = vst [vmem:[#allocation3 + $0x8] sm:$0xff] %v319_v33  ;;  %v314_v35 = vadd.f32 %v345_v31, %v313_v34 }
 0x307   :  { %322 = vst [vmem:[#allocation3] sm:$0xff] %v314_v35 }
 0x308   :  { %408 = shalt.err (!%p405_p4)
}
 0x309   :  { %s420_s26 = smov 128   ;;  %s421_s27 = smov 8  }
 0x30a   :  { %335 = dma.vmem_to_hbm [thread:$0]  %s330_s24, 256, %s524_s7, [#allocation4], %s420_s26, %s420_s26, %s421_s27  }
 0x30b   :  { %417 = dma.done.wait [#allocation4], 256  }
 0x30c   :  { %418 = vsyncadd [#allocation4], 4294967040 }
 0x30d   :  { %339 = vsyncpa [#allocation4], 1 }

// kernel: mlm_task_forward.5
= control target key start
LH: loop header
LB: loop body
LE: loop exit
PB: predicated region body
PF: predicated region fallthrough
CT: control target
= control target key end

     0   :  { %s1511_s25 = smov 0   ;;  %s1686_s0 = inlined_call_operand.vmem [shape: f32[2,8,32], index: 0, kind: input, shape index: {}]   ;;  %s1687_s1 = inlined_call_operand.vmem [shape: f32[32,96], index: 1, kind: input, shape index: {}]   ;;  %s1688_s2 = inlined_call_operand.vmem [shape: f32[1,96], index: 2, kind: input, shape index: {}]   ;;  %s1689_s3 = inlined_call_operand.vmem [shape: f32[32,32], index: 3, kind: input, shape index: {}]   ;;  %s1690_s4 = inlined_call_operand.vmem [shape: f32[1,32], index: 4, kind: input, shape index: {}]   ;;  %s1691_s5 = inlined_call_operand.vmem [shape: f32[1,32], index: 5, kind: input, shape index: {}]   ;;  %s1692_s6 = inlined_call_operand.vmem [shape: f32[1,32], index: 6, kind: input, shape index: {}]   ;;  %s1693_s7 = inlined_call_operand.vmem [shape: f32[32,64], index: 7, kind: input, shape index: {}]   ;;  %s1694_s8 = inlined_call_operand.vmem [shape: f32[1,64], index: 8, kind: input, shape index: {}]   ;;  %s1695_s9 = inlined_call_operand.vmem [shape: f32[64,32], index: 9, kind: input, shape index: {}]   ;;  %s1696_s10 = inlined_call_operand.vmem [shape: f32[1,32], index: 10, kind: input, shape index: {}]   ;;  %s1697_s11 = inlined_call_operand.vmem [shape: f32[1,32], index: 11, kind: input, shape index: {}]   ;;  %s1698_s12 = inlined_call_operand.vmem [shape: f32[1,32], index: 12, kind: input, shape index: {}]   ;;  %s1699_s13 = inlined_call_operand.vmem [shape: f32[2,8,32], index: 13, kind: output, shape index: {}]  }
   0x1 LB: > { %s1262_s26 = sadd.s32 4294967295, %s1431_s25   ;;  %p1266_p0 = scmp.ge.s32.totalorder %s1431_s25, 1  ;;  %s1431_s25 = sphi %s1511_s25, %s23_s25  }
   0x2   : > { %p386_p1 = scmp.lt.s32.totalorder %s1431_s25, 3 }
   0x4   : > { %p387_p2 = pnand %p1266_p0, %p386_p1 }
   0x5   : > { %p428_p3 = scmp.lt.s32.totalorder (!%p387_p2), %s1262_s26, 1  ;;  %s1435_s24 = smov (!%p387_p2), 96  }
   0x6   : > { %390 = sbr.rel (%p387_p2) target bundleno = 2415 (0x96f), region = 72  ;;  %s1436_s27 = smov (!%p387_p2), 112  }
   0x7   : > { %s1437_s28 = smov (!%p387_p2), 80   ;;  %s1438_s29 = smov (!%p387_p2), 48  }
   0x8   : > { %s1439_s30 = smov (!%p387_p2), 64   ;;  %s1440_s23 = smov (!%p387_p2), 16  }
   0xb   : > { %v440_v0 = vld [vmem:[%s1687_s1 + $0x18] sm:$0xff]  ;;  %v1433_v1 = vmov 0.0   ;;  %v439_v2 = vld [vmem:[%s1687_s1 + $0x10] sm:$0xff]  ;;  %vm1434_vm0 = vmmov 0   ;;  %s1701_s26 = smov (!%p428_p3, %s1262_s26), 1  ;;  %v438_v3 = vld [vmem:[%s1687_s1 + $0x8] sm:$0xff] }
   0xc   : > { %1321 = vmatprep.subr.mxu1 %v1433_v1  ;;  %1329 = vmatprep.mubr.msk.f32.mxu1 %vm1434_vm0, %v1433_v1  ;;  %s1267_s16 = sshll.u32 %s1701_s26, 3  ;;  %v437_v4 = vld [vmem:[%s1687_s1] sm:$0xff]  ;;  %vm448_vm1 = vcmask 261120   ;;  %vm526_vm2 = vcmask 130048   ;;  %vm602_vm3 = vcmask 64512   ;;  %v866_v38 = vld [vmem:[%s1689_s3 + $0x18] sm:$0xff] }
   0xd   : > { %1322 = vmatpush3.msra.mxu1 %v440_v0  ;;  %1342 = vmatprep.subr.mxu0 %v1433_v1  ;;  %s431_s21 = scalar_lea.vmem %s1686_s0, %s1267_s16  ;;  %v1269_v6 = vld [vmem:[%s1688_s2] ss:$0 sm:$0xff]  ;;  %v865_v39 = vld [vmem:[%s1689_s3 + $0x10] sm:$0xff]  ;;  %v864_v40 = vld [vmem:[%s1689_s3 + $0x8] sm:$0xff]  ;;  %vm860_vm4 = vcmask 261248   ;;  %vm1104_vm6 = vcmask 523264   ;;  %s435_s22 = scalar_lea.vmem %s1699_s13, %s1267_s16 }
   0xe   : > { %1323 = vmatprep.subr.mxu1 %v1433_v1  ;;  %1344 = vmatprep.mubr.msk.f32.mxu0 %vm1434_vm0, %v1433_v1  ;;  %v1547_v5 = vld [vmem:[%s431_s21] sm:$0xff]  ;;  %v981_v59 = vld [vmem:[%s1693_s7 + $0x18] sm:$0xff]  ;;  %v980_v60 = vld [vmem:[%s1693_s7 + $0x10] sm:$0xff] }
   0xf   : > { %1324 = vmatpush3.msra.mxu1 %v439_v2  ;;  %v863_v41 = vld [vmem:[%s1689_s3] sm:$0xff]  ;;  %v979_v61 = vld [vmem:[%s1693_s7 + $0x8] sm:$0xff] }
  0x10   : > { %1325 = vmatprep.subr.mxu1 %v1433_v1  ;;  %v1277_v48 = vld [vmem:[%s1690_s4] ss:$0 sm:$0xff] }
  0x11   : > { %1326 = vmatpush3.msra.mxu1 %v438_v3  ;;  %v978_v62 = vld [vmem:[%s1693_s7] sm:$0xff] }
  0x12   : > { %1327 = vmatprep.subr.mxu1 %v1433_v1 }
  0x13   : > { %1328 = vmatpush3.msra.mxu1 %v437_v4  ;;  %v1279_v4 = vld [vmem:[%s1691_s5] ss:$0 sm:$0xff] }
  0x14   : > { %1330 = vmatmul.mubr.msk.f32.vlgmr.msra.gmra.mxu1 %vm448_vm1, %v1547_v5  ;;  %1332 = vmatprep.subr.mxu1 %v1433_v1 }
  0x15   : > { %1334 = vmatprep.mubr.msk.f32.mxu1 %vm1434_vm0, %v1433_v1 }
  0xd4   : > { %v518_v7 = vpop.f32.mrf.mxu1 }
  0xd5   : > { %v519_v8 = vadd.f32 %v1269_v6, %v518_v7  ;;  %v1280_v6 = vld [vmem:[%s1692_s6] ss:$0 sm:$0xff] }
  0xd6   : > { %v1331_v9 = vpop.f32.mrf.mxu1 }
  0xd7   : > { %524 = vrot.lane.b32.xlu0 %v519_v8, %s1435_s24  ;;  %v522_v10 = vmul.f32 0.25, %v519_v8  ;;  %v1096_v9 = vld [vmem:[%s1695_s9 + $0x38] sm:$0xff] }
  0xd9   : > { %691 = vrot.lane.b32.xlu1 %v522_v10, %s1436_s27 }
  0xdb   : > { %693 = vrot.lane.b32.xlu0 %v519_v8, %s1437_s28 }
 0x149   : > { %v525_v11 = vpop.permute.xlu0 %524 }
 0x14a   : > { %1333 = vmatpush3.xpose.msk.msra.mxu1 %vm526_vm2, %v525_v11  ;;  %v1094_v11 = vld [vmem:[%s1695_s9 + $0x28] sm:$0xff] }
 0x14b   : > { %1337 = vmatprep.subr.mxu1 %v1433_v1  ;;  %v692_v13 = vpop.permute.xlu1 %691 }
 0x14d   : > { %v694_v12 = vpop.permute.xlu0 %693  ;;  %1335 = vmatmul.mubr.msk.f32.vlgmr.msra.gmra.mxu1 %vm526_vm2, %v522_v10  ;;  %v1095_v10 = vld [vmem:[%s1695_s9 + $0x30] sm:$0xff] }
 0x14e   : > { %1343 = vmatpush3.xpose.msk.msra.mxu0 %vm526_vm2, %v694_v12  ;;  %1339 = vmatprep.mubr.msk.f32.mxu1 %vm1434_vm0, %v1433_v1  ;;  %v1093_v12 = vld [vmem:[%s1695_s9 + $0x20] sm:$0xff] }
 0x14f   : > { %1352 = vmatprep.subr.mxu0 %v1433_v1 }
 0x151   : > { %1345 = vmatmul.mubr.msk.f32.vlgmr.msra.gmra.mxu0 %vm526_vm2, %v692_v13  ;;  %v1092_v13 = vld [vmem:[%s1695_s9 + $0x18] sm:$0xff] }
 0x152   : > { %1360 = vmatprep.mubr.msk.f32.mxu0 %vm1434_vm0, %v1433_v1  ;;  %1353 = vmatpush3.msra.mxu0 %v866_v38 }
 0x153   : > { %1354 = vmatprep.subr.mxu0 %v1433_v1 }
 0x154   : > { %1355 = vmatpush3.msra.mxu0 %v865_v39 }
 0x155   : > { %1356 = vmatprep.subr.mxu0 %v1433_v1 }
 0x156   : > { %1357 = vmatpush3.msra.mxu0 %v864_v40 }
 0x157   : > { %1358 = vmatprep.subr.mxu0 %v1433_v1 }
 0x158   : > { %1359 = vmatpush3.msra.mxu0 %v863_v41 }
 0x159   : > { %1374 = vmatprep.subr.mxu0 %v1433_v1 }
 0x20d   : > { %v598_v14 = vpop.f32.mrf.mxu1 }
 0x20e   : > { %v603_v15 = vsel %vm602_vm3, %v598_v14, -inf }
 0x20f   : > { %604 = vmax.xlane.f32.xlu1 %v603_v15  ;;  %v1336_v16 = vpop.f32.mrf.mxu1  ;;  %v1090_v15 = vld [vmem:[%s1695_s9 + $0x8] sm:$0xff] }
 0x210   : > { %v1089_v16 = vld [vmem:[%s1695_s9] sm:$0xff] }
 0x211   : > { %v765_v17 = vpop.f32.mrf.mxu0 }
 0x212   : > { %v769_v18 = vsel %vm602_vm3, %v765_v17, -inf }
 0x213   : > { %770 = vmax.xlane.f32.xlu0 %v769_v18  ;;  %v1346_v19 = vpop.f32.mrf.mxu0 }
 0x298   : > { %v605_v20 = vpop.xlane.xlu1 %604 }
 0x299   : > { %v606_v21 = vsub.f32 %v598_v14, %v605_v20  ;;  %v1091_v14 = vld [vmem:[%s1695_s9 + $0x10] sm:$0xff] }
 0x29b   : > { %v607_v22 = vmul.f32 1.442695, %v606_v21 }
 0x29c   : > { %v771_v23 = vpop.xlane.xlu0 %770 }
 0x29d   : > { %1409 = vpow2.f32 %v607_v22  ;;  %v772_v24 = vsub.f32 %v765_v17, %v771_v23  ;;  %v1281_v17 = vld [vmem:[%s1694_s8] ss:$0 sm:$0xff] }
 0x29f   : > { %v773_v25 = vmul.f32 1.442695, %v772_v24 }
 0x2a1   : > { %1411 = vpow2.f32 %v773_v25 }
 0x2aa   : > { %v1410_v26 = vpop.eup %1409 }
 0x2ab   : > { %v609_v27 = vsel %vm602_vm3, %v1410_v26, 0.0 }
 0x2ac   : > { %610 = vadd.xlane.f32.xlu0 %v609_v27 }
 0x2ae   : > { %v1412_v28 = vpop.eup %1411 }
 0x2af   : > { %v775_v29 = vsel %vm602_vm3, %v1412_v28, 0.0 }
 0x2b0   : > { %776 = vadd.xlane.f32.xlu1 %v775_v29 }
 0x2c1   : > { %780 = vrot.lane.b32.xlu1 %v519_v8, %s1438_s29 }
 0x2c2   : > { %614 = vrot.lane.b32.xlu0 %v519_v8, %s1439_s30 }
 0x335   : > { %v611_v30 = vpop.xlane.xlu0 %610 }
 0x336   : > { %1413 = vrcp.f32 %v611_v30 }
 0x339   : > { %v615_v31 = vpop.permute.xlu0 %614  ;;  %v777_v32 = vpop.xlane.xlu1 %776 }
 0x33a   : > { %1415 = vrcp.f32 %v777_v32  ;;  %1338 = vmatpush3.msra.mxu1 %v615_v31 }
 0x33b   : > { %1347 = vmatprep.subr.mxu1 %v1433_v1 }
 0x33d   : > { %v781_v35 = vpop.permute.xlu1 %780 }
 0x343   : > { %v1414_v33 = vpop.eup %1413 }
 0x344   : > { %v613_v34 = vmul.f32 %v1414_v33, %v1410_v26 }
 0x346   : > { %1340 = vmatmul.mubr.msk.f32.vlgmr.msra.gmra.mxu1 %vm602_vm3, %v613_v34 }
 0x347   : > { %v1416_v36 = vpop.eup %1415  ;;  %1348 = vmatpush3.msra.mxu1 %v781_v35  ;;  %1349 = vmatprep.mubr.msk.f32.mxu1 %vm1434_vm0, %v1433_v1 }
 0x348   : > { %v779_v37 = vmul.f32 %v1416_v36, %v1412_v28  ;;  %1363 = vmatprep.subr.mxu1 %v1433_v1 }
 0x34a   : > { %1350 = vmatmul.mubr.msk.f32.vlgmr.msra.gmra.mxu1 %vm602_vm3, %v779_v37 }
 0x34b   : > { %1371 = vmatprep.mubr.msk.f32.mxu1 %vm1434_vm0, %v1433_v1  ;;  %1364 = vmatpush3.msra.mxu1 %v981_v59 }
 0x34c   : > { %1365 = vmatprep.subr.mxu1 %v1433_v1 }
 0x34d   : > { %1366 = vmatpush3.msra.mxu1 %v980_v60  ;;  %v1285_v60 = vld [vmem:[%s1697_s11] ss:$0 sm:$0xff] }
 0x34e   : > { %1367 = vmatprep.subr.mxu1 %v1433_v1 }
 0x34f   : > { %1368 = vmatpush3.msra.mxu1 %v979_v61 }
 0x350   : > { %1369 = vmatprep.subr.mxu1 %v1433_v1 }
 0x351   : > { %1370 = vmatpush3.msra.mxu1 %v978_v62  ;;  %v1286_v62 = vld [vmem:[%s1698_s12] ss:$0 sm:$0xff] }
 0x406   : > { %v686_v42 = vpop.f32.mrf.mxu1 }
 0x407   : > { %690 = vst.msk [vmem:[#allocation2] sm:$0xff] %vm526_vm2, %v686_v42 }
 0x408   : > { %v1341_v43 = vpop.f32.mrf.mxu1 }
 0x40a   : > { %v852_v44 = vpop.f32.mrf.mxu1 }
 0x40b   : > { %857 = vrot.lane.b32.xlu1 %v852_v44, %s1440_s23 }
 0x40c   : > { %v1351_v45 = vpop.f32.mrf.mxu1 }
 0x40d   : > { %v1283_v45 = vld [vmem:[%s1696_s10] ss:$0 sm:$0xff] }
 0x47d   : > { %v858_v46 = vpop.permute.xlu1 %857 }
 0x47e   : > { %861 = vst.msk [vmem:[#allocation2] sm:$0xff] %vm860_vm4, %v858_v46 }
 0x485   : > { %v862_v47 = vld [vmem:[#allocation2] sm:$0xff] }
 0x486   : > { %1361 = vmatmul.mubr.msk.f32.vlgmr.msra.gmra.mxu0 %vm448_vm1, %v862_v47 }
 0x487   : > { %1390 = vmatprep.mubr.msk.f32.mxu0 %vm1434_vm0, %v1433_v1  ;;  %1375 = vmatpush3.msra.mxu0 %v1096_v9 }
 0x488   : > { %1376 = vmatprep.subr.mxu0 %v1433_v1 }
 0x489   : > { %1377 = vmatpush3.msra.mxu0 %v1095_v10 }
 0x48a   : > { %1378 = vmatprep.subr.mxu0 %v1433_v1 }
 0x48b   : > { %1379 = vmatpush3.msra.mxu0 %v1094_v11 }
 0x48c   : > { %1380 = vmatprep.subr.mxu0 %v1433_v1 }
 0x48d   : > { %1381 = vmatpush3.msra.mxu0 %v1093_v12 }
 0x48e   : > { %1382 = vmatprep.subr.mxu0 %v1433_v1 }
 0x48f   : > { %1383 = vmatpush3.msra.mxu0 %v1092_v13 }
 0x490   : > { %1384 = vmatprep.subr.mxu0 %v1433_v1 }
 0x491   : > { %1385 = vmatpush3.msra.mxu0 %v1091_v14 }
 0x492   : > { %1386 = vmatprep.subr.mxu0 %v1433_v1 }
 0x493   : > { %1387 = vmatpush3.msra.mxu0 %v1090_v15 }
 0x494   : > { %1388 = vmatprep.subr.mxu0 %v1433_v1 }
 0x495   : > { %1389 = vmatpush3.msra.mxu0 %v1089_v16 }
 0x546   : > { %v943_v49 = vpop.f32.mrf.mxu0 }
 0x547   : > { %v944_v50 = vadd.f32 %v1277_v48, %v943_v49 }
 0x548   : > { %v1362_v51 = vpop.f32.mrf.mxu0 }
 0x549   : > { %v947_v52 = vadd.f32 %v944_v50, %v1547_v5 }
 0x54b   : > { %v950_v53 = vsel %vm448_vm1, %v947_v52, 0.0 }
 0x54c   : > { %951 = vadd.xlane.f32.xlu0 %v950_v53 }
 0x5d5   : > { %v952_v54 = vpop.xlane.xlu0 %951 }
 0x5d6   : > { %v954_v55 = vmul.f32 0.03125, %v952_v54 }
 0x5d8   : > { %v955_v56 = vsub.f32 %v947_v52, %v954_v55 }
 0x5da   : > { %v956_v57 = vmul.f32 %v955_v56, %v955_v56 }
 0x5dc   : > { %v957_v58 = vsel %vm448_vm1, %v956_v57, 0.0 }
 0x5dd   : > { %958 = vadd.xlane.f32.xlu1 %v957_v58 }
 0x666   : > { %v959_v63 = vpop.xlane.xlu1 %958 }
 0x667   : > { %v960_v0 = vmul.f32 0.03125, %v959_v63 }
 0x669   : > { %v961_v2 = vadd.f32 1e-05, %v960_v0 }
 0x66b   : > { %1417 = vrsqrt.f32 %v961_v2 }
 0x678   : > { %v1418_v3 = vpop.eup %1417 }
 0x679   : > { %v963_v5 = vmul.f32 %v1418_v3, %v955_v56 }
 0x67b   : > { %v970_v7 = vmul.f32 %v1279_v4, %v963_v5 }
 0x67d   : > { %v1627_v8 = vadd.f32 %v1280_v6, %v970_v7 }
 0x67f   : > { %1372 = vmatmul.mubr.msk.f32.vlgmr.msra.gmra.mxu1 %vm448_vm1, %v1627_v8 }
 0x73f   : > { %v1058_v18 = vpop.f32.mrf.mxu1 }
 0x740   : > { %v1059_v19 = vadd.f32 %v1281_v17, %v1058_v18 }
 0x741   : > { %v1373_v20 = vpop.f32.mrf.mxu1 }
 0x742   : > { %v1063_v21 = vmul.f32 0.70710677, %v1059_v19  ;;  %v1062_v42 = vmul.f32 0.5, %v1059_v19 }
 0x744   : > { %v1064_v22 = vand.u32 2147483647, %v1063_v21  ;;  %vm1084_vm5 = vcmp.ge.f32.partialorder %v1063_v21, 0.0 }
 0x746   : > { %v1065_v23 = vmul.f32 0.3275911, %v1064_v22  ;;  %v1078_v25 = vmul.f32 %v1064_v22, %v1064_v22 }
 0x748   : > { %v1066_v24 = vadd.f32 1.0, %v1065_v23  ;;  %v1079_v26 = vsub.f32 0.0, %v1078_v25 }
 0x74a   : > { %1419 = vrcp.f32 %v1066_v24  ;;  %v1080_v29 = vmul.f32 1.442695, %v1079_v26 }
 0x74c   : > { %1421 = vpow2.f32 %v1080_v29 }
 0x757   : > { %v1420_v27 = vpop.eup %1419 }
 0x758   : > { %v1069_v28 = vmul.f32 1.0614054, %v1420_v27 }
 0x759   : > { %v1422_v37 = vpop.eup %1421 }
 0x75a   : > { %v1070_v30 = vadd.f32 -1.4531521, %v1069_v28 }
 0x75c   : > { %v1071_v1 = vmul.f32 %v1420_v27, %v1070_v30 }
 0x75e   : > { %v1072_v31 = vadd.f32 1.4214138, %v1071_v1 }
 0x760   : > { %v1073_v32 = vmul.f32 %v1420_v27, %v1072_v31 }
 0x762   : > { %v1074_v33 = vadd.f32 -0.28449672, %v1073_v32 }
 0x764   : > { %v1075_v34 = vmul.f32 %v1420_v27, %v1074_v33 }
 0x766   : > { %v1076_v35 = vadd.f32 0.2548296, %v1075_v34 }
 0x768   : > { %v1077_v36 = vmul.f32 %v1420_v27, %v1076_v35 }
 0x76a   : > { %v1082_v38 = vmul.f32 %v1422_v37, %v1077_v36 }
 0x76c   : > { %v1083_v39 = vsub.f32 1.0, %v1082_v38 }
 0x76e   : > { %v1085_v40 = vsub.f32 0.0, %v1083_v39 }
 0x770   : > { %v1086_v41 = vsel %vm1084_vm5, %v1083_v39, %v1085_v40 }
 0x771   : > { %v1087_v43 = vadd.f32 1.0, %v1086_v41 }
 0x773   : > { %v1088_v44 = vmul.f32 %v1087_v43, %v1062_v42 }
 0x775   : > { %1391 = vmatmul.mubr.msk.f32.vlgmr.msra.gmra.mxu0 %vm1104_vm6, %v1088_v44 }
 0x835   : > { %v1174_v46 = vpop.f32.mrf.mxu0 }
 0x836   : > { %v1175_v47 = vadd.f32 %v1283_v45, %v1174_v46 }
 0x837   : > { %v1392_v48 = vpop.f32.mrf.mxu0 }
 0x838   : > { %v1178_v49 = vadd.f32 %v1175_v47, %v1627_v8 }
 0x83a   : > { %v1181_v50 = vsel %vm448_vm1, %v1178_v49, 0.0 }
 0x83b   : > { %1182 = vadd.xlane.f32.xlu0 %v1181_v50 }
 0x8c4   : > { %v1183_v51 = vpop.xlane.xlu0 %1182 }
 0x8c5   : > { %v1184_v52 = vmul.f32 0.03125, %v1183_v51 }
 0x8c7   : > { %v1185_v53 = vsub.f32 %v1178_v49, %v1184_v52 }
 0x8c9   : > { %v1186_v54 = vmul.f32 %v1185_v53, %v1185_v53 }
 0x8cb   : > { %v1187_v55 = vsel %vm448_vm1, %v1186_v54, 0.0 }
 0x8cc   : > { %1188 = vadd.xlane.f32.xlu0 %v1187_v55 }
 0x955   : > { %v1189_v56 = vpop.xlane.xlu0 %1188 }
 0x956   : > { %v1190_v57 = vmul.f32 0.03125, %v1189_v56 }
 0x958   : > { %v1191_v58 = vadd.f32 1e-05, %v1190_v57 }
 0x95a   : > { %1423 = vrsqrt.f32 %v1191_v58 }
 0x967   : > { %v1424_v59 = vpop.eup %1423 }
 0x968   : > { %v1193_v61 = vmul.f32 %v1424_v59, %v1185_v53 }
 0x96a   : > { %v1200_v63 = vmul.f32 %v1285_v60, %v1193_v61 }
 0x96c   : > { %v1207_v0 = vadd.f32 %v1286_v62, %v1200_v63 }
 0x96e   : > { %1208 = vst.msk [vmem:[%s435_s22] sm:$0xff] %vm448_vm1, %v1207_v0 }
 0x96f PF: > { %s23_s25 = sadd.s32 1, %s1431_s25  }
 0x970   : > { %p20_p4 = scmp.ge.s32.totalorder %s23_s25, 4  }
 0x972   :  { %22 = sbr.rel (!%p20_p4) target bundleno = 1 (0x1), region = 102 }

</bundles_post_ra>
